<compile_context>
chip_gen: v5e
topology: v5e:2x2
jax: 0.10.0
libtpu: 0.0.40
codegen_flags: <defaults>
</compile_context>

<pallas_src>
import math

import jax
import jax.numpy as jnp
import numpy as np
from jax.experimental import pallas as pl
from jax.experimental.pallas import tpu as pltpu  # noqa: F401  (TPU backend)

# ---------------- model configuration ----------------------------------------
D_MODEL = 32
N_HEADS = 4
D_KEY = D_MODEL // N_HEADS
D_FF = 4 * D_MODEL
EPS = 1e-5
NEG_INF = -1e30          # finite "masked" value; avoids -inf -> NaN propagation

BATCH = 2
TRG_LEN = 8
SRC_LEN = 10

BT = BATCH * TRG_LEN      # 16  batch-folded query rows
BS = BATCH * SRC_LEN      # 20  batch-folded source rows
HBT = N_HEADS * BT        # 64  head-and-batch stacked query rows
LANES = 128

# ---------------- packed parameter slab layout (rows x 128 lanes, f32) -------
RO_QKV1 = 0                       # [wq1|wk1|wv1]        (32, 96)
RO_QKV2 = RO_QKV1 + D_MODEL       # [wq2|wk2|wv2]        (32, 96)
RO_WO1 = RO_QKV2 + D_MODEL        # wo1                  (32, 32)
RO_WO2 = RO_WO1 + D_MODEL         # wo2                  (32, 32)
RO_W1 = RO_WO2 + D_MODEL          # ffn w1               (32, 128)
RO_W2 = RO_W1 + D_MODEL           # ffn w2               (128, 32)
RO_HMASK = RO_W2 + D_FF           # per-head lane mask   (HBT, 32)
RO_EXPAND = RO_HMASK + HBT        # row-expand selector  (HBT, BT)
RO_FOLD = RO_EXPAND + HBT         # head-fold selector   (BT, HBT)
RO_XBIAS = RO_FOLD + BT           # cross-attn additive bias (HBT, BS)
RO_VEC = RO_XBIAS + HBT           # packed bias / LN vector rows
VR_BQKV1, VR_BQKV2, VR_BO1, VR_BO2 = 0, 1, 2, 3
VR_C1, VR_C2 = 4, 5
VR_G1, VR_BE1, VR_G2, VR_BE2, VR_G3, VR_BE3 = 6, 7, 8, 9, 10, 11
N_VEC_ROWS = 12
R_TOTAL = -(-(RO_VEC + N_VEC_ROWS) // 8) * 8      # pad rows to a multiple of 8

# ---------------- single lane-padded output slab layout ----------------------
RO_OUT_SELF = 0                   # rows   0: 64, lanes 0:BT -> stacked self probs
RO_OUT_CROSS = HBT                # rows  64:128, lanes 0:BS -> stacked cross probs
RO_OUT_X = 2 * HBT                # rows 128:144, lanes 0:D  -> decoder output
OUT_ROWS = 2 * HBT + BT           # 144 (multiple of 8)


# ---------------- in-kernel helpers -------------------------------------------
def _dot(a, b):
    return jnp.dot(a, b, preferred_element_type=jnp.float32)


def _dot_bt(a, b):
    """a @ b.T as an explicit transposed-RHS contraction (no K transpose copy)."""
    return jax.lax.dot_general(a, b, (((1,), (1,)), ((), ())),
                               preferred_element_type=jnp.float32)


def _layer_norm(x, g, b):
    mu = jnp.mean(x, axis=-1, keepdims=True)
    var = jnp.mean((x - mu) ** 2, axis=-1, keepdims=True)
    return (x - mu) * jax.lax.rsqrt(var + EPS) * g + b


def _softmax_rows(scores):
    m = jnp.max(scores, axis=-1, keepdims=True)
    e = jnp.exp(scores - m)
    inv = pl.reciprocal(jnp.sum(e, axis=-1, keepdims=True), approx=True)
    return e * inv


# ---------------- the fused decoder-layer kernel (single invocation) ----------
def decoder_layer_kernel(x_ref, s_ref, bias_ref, p_ref, out_ref):
    D = D_MODEL
    scale = 1.0 / math.sqrt(D_KEY)

    x = x_ref[...]                 # (BT, D)   batch-folded captions
    src = s_ref[...]               # (BS, D)   batch-folded image features
    bias_self = bias_ref[...]      # (HBT, BT) additive causal + cross-batch bias

    # ---- parameters: static slices out of the single packed slab ------------
    wqkv1 = p_ref[RO_QKV1:RO_QKV1 + D, 0:3 * D]
    wqkv2 = p_ref[RO_QKV2:RO_QKV2 + D, 0:3 * D]
    wo1 = p_ref[RO_WO1:RO_WO1 + D, 0:D]
    wo2 = p_ref[RO_WO2:RO_WO2 + D, 0:D]
    w1 = p_ref[RO_W1:RO_W1 + D, 0:D_FF]
    w2 = p_ref[RO_W2:RO_W2 + D_FF, 0:D]
    head_mask = p_ref[RO_HMASK:RO_HMASK + HBT, 0:D]        # (HBT, D)
    expand_m = p_ref[RO_EXPAND:RO_EXPAND + HBT, 0:BT]      # (HBT, BT)
    fold_m = p_ref[RO_FOLD:RO_FOLD + BT, 0:HBT]            # (BT, HBT)
    bias_cross = p_ref[RO_XBIAS:RO_XBIAS + HBT, 0:BS]      # (HBT, BS)
    vec = p_ref[RO_VEC:RO_VEC + N_VEC_ROWS, :]              # (12, 128)
    bqkv1 = vec[VR_BQKV1:VR_BQKV1 + 1, 0:3 * D]
    bqkv2 = vec[VR_BQKV2:VR_BQKV2 + 1, 0:3 * D]
    bo1 = vec[VR_BO1:VR_BO1 + 1, 0:D]
    bo2 = vec[VR_BO2:VR_BO2 + 1, 0:D]
    c1 = vec[VR_C1:VR_C1 + 1, 0:D_FF]
    c2 = vec[VR_C2:VR_C2 + 1, 0:D]
    g1, be1 = vec[VR_G1:VR_G1 + 1, 0:D], vec[VR_BE1:VR_BE1 + 1, 0:D]
    g2, be2 = vec[VR_G2:VR_G2 + 1, 0:D], vec[VR_BE2:VR_BE2 + 1, 0:D]
    g3, be3 = vec[VR_G3:VR_G3 + 1, 0:D], vec[VR_BE3:VR_BE3 + 1, 0:D]

    def attention(x_q, x_kv, wqkv, bqkv, wo, bo, bias, self_attn):
        if self_attn:
            qkv = _dot(x_q, wqkv) + bqkv                       # (BT, 3D) fused QKV
            q, k, v = qkv[:, 0:D], qkv[:, D:2 * D], qkv[:, 2 * D:3 * D]
        else:
            q = _dot(x_q, wqkv[:, 0:D]) + bqkv[:, 0:D]         # (BT, D)
            kv = _dot(x_kv, wqkv[:, D:3 * D]) + bqkv[:, D:3 * D]
            k, v = kv[:, 0:D], kv[:, D:2 * D]                  # (Lk, D)

        # Stack query heads along sublanes (row = h*BT + b*T + q) with a
        # constant selector matmul (MXU) + per-head lane mask.
        q_stack = _dot(expand_m, q) * head_mask                # (HBT, D)
        scores = _dot_bt(q_stack, k) * scale + bias            # (HBT, Lk)
        probs = _softmax_rows(scores)                          # (HBT, Lk)
        a_stack = _dot(probs, v) * head_mask                   # (HBT, D)
        a = _dot(fold_m, a_stack)                              # (BT, D) heads folded
        return _dot(a, wo) + bo, probs

    # TODO(synk): dropout is treated as eval-mode identity (no RNG applied).
    # ---- masked self-attention + residual + LayerNorm ------------------------
    t, self_probs = attention(x, x, wqkv1, bqkv1, wo1, bo1, bias_self, True)
    x = _layer_norm(x + t, g1, be1)

    # ---- cross-attention (query = trg, key/value = src) ----------------------
    t, cross_probs = attention(x, src, wqkv2, bqkv2, wo2, bo2, bias_cross, False)
    x = _layer_norm(x + t, g2, be2)

    # ---- position-wise feed-forward -------------------------------------------
    hidden = jnp.maximum(_dot(x, w1) + c1, 0.0)
    t = _dot(hidden, w2) + c2
    x = _layer_norm(x + t, g3, be3)

    # ---- single lane-padded output slab (one dense writeback stream) ---------
    out_ref[RO_OUT_SELF:RO_OUT_SELF + HBT, 0:BT] = self_probs
    out_ref[RO_OUT_CROSS:RO_OUT_CROSS + HBT, 0:BS] = cross_probs
    out_ref[RO_OUT_X:RO_OUT_X + BT, 0:D] = x


# ---------------- host-side wrapper --------------------------------------------
def _build_self_bias(trg_mask):
    """(B,1,T,T) 0/1 mask -> (HBT, BT) additive bias with cross-batch blocking."""
    m = trg_mask[:, 0].astype(jnp.float32)                      # (B, T, T)
    eye_b = jnp.eye(BATCH, dtype=jnp.float32)
    allowed = jnp.einsum("bc,bqk->bqck", eye_b, m)              # (B, T, B, T)
    allowed = allowed.reshape(BT, BT)
    bias = jnp.where(allowed == 0, NEG_INF, 0.0).astype(jnp.float32)
    return jnp.tile(bias, (N_HEADS, 1))                         # (HBT, BT)


@jax.jit
def decoder_layer(trg, src, trg_mask, param_slab):
    B, T, D = trg.shape
    S = src.shape[1]
    H = N_HEADS

    # Single kernel invocation (no grid): all refs are whole arrays in VMEM.
    slab = pl.pallas_call(
        decoder_layer_kernel,
        out_shape=jax.ShapeDtypeStruct((OUT_ROWS, LANES), jnp.float32),
    )(trg.reshape(B * T, D), src.reshape(B * S, D),
      _build_self_bias(trg_mask), param_slab)

    # Unfold the head/batch-stacked, lane-padded output slab on the host.
    out = slab[RO_OUT_X:RO_OUT_X + B * T, 0:D].reshape(B, T, D)
    sp = slab[RO_OUT_SELF:RO_OUT_SELF + H * B * T, 0:B * T].reshape(H, B, T, B, T)
    cp = slab[RO_OUT_CROSS:RO_OUT_CROSS + H * B * T, 0:B * S].reshape(H, B, T, B, S)
    self_probs = jnp.stack([sp[:, b, :, b, :] for b in range(B)], axis=0)   # (B,H,T,T)
    cross_probs = jnp.stack([cp[:, b, :, b, :] for b in range(B)], axis=0)  # (B,H,T,S)
    return out, cross_probs, self_probs


# ---------------- deterministic parameter init ---------------------------------
def init_params(key):
    keys = jax.random.split(key, 32)
    it = iter(keys)

    def lin(din, dout):
        w = jax.random.normal(next(it), (din, dout), jnp.float32) * 0.02
        b = jax.random.normal(next(it), (1, dout), jnp.float32) * 0.02
        return w, b

    p = {}
    p["wq1"], p["bq1"] = lin(D_MODEL, D_MODEL)
    p["wk1"], p["bk1"] = lin(D_MODEL, D_MODEL)
    p["wv1"], p["bv1"] = lin(D_MODEL, D_MODEL)
    p["wo1"], p["bo1"] = lin(D_MODEL, D_MODEL)
    p["g1"] = jnp.ones((1, D_MODEL), jnp.float32)
    p["be1"] = jnp.zeros((1, D_MODEL), jnp.float32)
    p["wq2"], p["bq2"] = lin(D_MODEL, D_MODEL)
    p["wk2"], p["bk2"] = lin(D_MODEL, D_MODEL)
    p["wv2"], p["bv2"] = lin(D_MODEL, D_MODEL)
    p["wo2"], p["bo2"] = lin(D_MODEL, D_MODEL)
    p["g2"] = jnp.ones((1, D_MODEL), jnp.float32)
    p["be2"] = jnp.zeros((1, D_MODEL), jnp.float32)
    p["w1"], p["c1"] = lin(D_MODEL, D_FF)
    p["w2"], p["c2"] = lin(D_FF, D_MODEL)
    p["g3"] = jnp.ones((1, D_MODEL), jnp.float32)
    p["be3"] = jnp.zeros((1, D_MODEL), jnp.float32)
    return p


def pack_params(p):
    """Pack parameters + constant selector matrices into one (R_TOTAL,128) slab."""
    slab = np.zeros((R_TOTAL, LANES), np.float32)

    def cat_w(*ws):
        return np.concatenate([np.asarray(w) for w in ws], axis=1)

    slab[RO_QKV1:RO_QKV1 + D_MODEL, 0:3 * D_MODEL] = cat_w(p["wq1"], p["wk1"], p["wv1"])
    slab[RO_QKV2:RO_QKV2 + D_MODEL, 0:3 * D_MODEL] = cat_w(p["wq2"], p["wk2"], p["wv2"])
    slab[RO_WO1:RO_WO1 + D_MODEL, 0:D_MODEL] = np.asarray(p["wo1"])
    slab[RO_WO2:RO_WO2 + D_MODEL, 0:D_MODEL] = np.asarray(p["wo2"])
    slab[RO_W1:RO_W1 + D_MODEL, 0:D_FF] = np.asarray(p["w1"])
    slab[RO_W2:RO_W2 + D_FF, 0:D_MODEL] = np.asarray(p["w2"])

    # per-head lane mask: row h*BT + i keeps the lanes of head h
    hm = (np.arange(HBT)[:, None] // BT ==
          np.arange(D_MODEL)[None, :] // D_KEY).astype(np.float32)
    slab[RO_HMASK:RO_HMASK + HBT, 0:D_MODEL] = hm

    # expand selector (replicate Q rows per head) and its transpose (head fold)
    em = (np.arange(HBT)[:, None] % BT == np.arange(BT)[None, :]).astype(np.float32)
    slab[RO_EXPAND:RO_EXPAND + HBT, 0:BT] = em
    slab[RO_FOLD:RO_FOLD + BT, 0:HBT] = em.T

    # cross-attention additive bias: block attention across batch elements
    qb = (np.arange(HBT) % BT) // TRG_LEN
    kb = np.arange(BS) // SRC_LEN
    slab[RO_XBIAS:RO_XBIAS + HBT, 0:BS] = np.where(
        qb[:, None] == kb[None, :], 0.0, NEG_INF).astype(np.float32)

    def vrow(r, *vs):
        v = np.concatenate([np.asarray(a)[0] for a in vs])
        slab[RO_VEC + r, 0:v.shape[0]] = v

    vrow(VR_BQKV1, p["bq1"], p["bk1"], p["bv1"])
    vrow(VR_BQKV2, p["bq2"], p["bk2"], p["bv2"])
    vrow(VR_BO1, p["bo1"])
    vrow(VR_BO2, p["bo2"])
    vrow(VR_C1, p["c1"])
    vrow(VR_C2, p["c2"])
    vrow(VR_G1, p["g1"]); vrow(VR_BE1, p["be1"])
    vrow(VR_G2, p["g2"]); vrow(VR_BE2, p["be2"])
    vrow(VR_G3, p["g3"]); vrow(VR_BE3, p["be3"])
    return jnp.asarray(slab)


# ---------------- float64 numpy reference (mirrors the PyTorch forward) --------
def reference_forward(trg, src, trg_mask, params):
    trg = np.asarray(trg, np.float64)
    src = np.asarray(src, np.float64)
    mask = np.asarray(trg_mask, np.float64)
    p = {k: np.asarray(v, np.float64) for k, v in params.items()}

    def linear(x, w, b):
        return x @ w + b[0]

    def softmax(x):
        m = np.max(x, axis=-1, keepdims=True)
        e = np.exp(x - m)
        return e / np.sum(e, axis=-1, keepdims=True)

    def mha(q_in, k_in, v_in, wq, bq, wk, bk, wv, bv, wo, bo, msk):
        B, Lq, D = q_in.shape
        Lk = k_in.shape[1]
        Q = linear(q_in, wq, bq).reshape(B, Lq, N_HEADS, D_KEY).transpose(0, 2, 1, 3)
        K = linear(k_in, wk, bk).reshape(B, Lk, N_HEADS, D_KEY).transpose(0, 2, 1, 3)
        V = linear(v_in, wv, bv).reshape(B, Lk, N_HEADS, D_KEY).transpose(0, 2, 1, 3)
        sc = np.einsum("bhqd,bhkd->bhqk", Q, K) / math.sqrt(D_KEY)
        if msk is not None:
            sc = np.where(msk == 0, -np.inf, sc)
        probs = softmax(sc)
        A = np.einsum("bhqk,bhkd->bhqd", probs, V)
        A = A.transpose(0, 2, 1, 3).reshape(B, Lq, D)
        return linear(A, wo, bo), probs

    def ln(x, g, b):
        mu = x.mean(-1, keepdims=True)
        var = ((x - mu) ** 2).mean(-1, keepdims=True)
        return (x - mu) / np.sqrt(var + EPS) * g[0] + b[0]

    _t, mprobs = mha(trg, trg, trg,
                     p["wq1"], p["bq1"], p["wk1"], p["bk1"],
                     p["wv1"], p["bv1"], p["wo1"], p["bo1"], mask)
    x = ln(trg + _t, p["g1"], p["be1"])
    _t, cprobs = mha(x, src, src,
                     p["wq2"], p["bq2"], p["wk2"], p["bk2"],
                     p["wv2"], p["bv2"], p["wo2"], p["bo2"], None)
    x = ln(x + _t, p["g2"], p["be2"])
    h = np.maximum(linear(x, p["w1"], p["c1"]), 0.0)
    _t = linear(h, p["w2"], p["c2"])
    x = ln(x + _t, p["g3"], p["be3"])
    return x, cprobs, mprobs


# ---------------- main -----------------------------------------------------------
if __name__ == "__main__":
    key = jax.random.PRNGKey(0)
    k_trg, k_src, k_par = jax.random.split(key, 3)

    trg = jax.random.normal(k_trg, (BATCH, TRG_LEN, D_MODEL), jnp.float32)
    src = jax.random.normal(k_src, (BATCH, SRC_LEN, D_MODEL), jnp.float32)
    causal = jnp.tril(jnp.ones((TRG_LEN, TRG_LEN), jnp.float32))
    trg_mask = jnp.broadcast_to(causal, (BATCH, 1, TRG_LEN, TRG_LEN))

    params = init_params(k_par)
    param_slab = pack_params(params)

    out, cross_probs, self_probs = decoder_layer(trg, src, trg_mask, param_slab)
    jax.block_until_ready(out)
    jax.block_until_ready(cross_probs)
    jax.block_until_ready(self_probs)

    ref_out, ref_cross, ref_self = reference_forward(trg, src, trg_mask, params)
    # Tolerances cover bf16-pass MXU matmuls and the approximate reciprocal,
    # while still catching any real logic error (which would be O(0.1+)).
    np.testing.assert_allclose(np.asarray(out), ref_out, rtol=2e-2, atol=3e-3)
    np.testing.assert_allclose(np.asarray(cross_probs), ref_cross, rtol=2e-2, atol=5e-3)
    np.testing.assert_allclose(np.asarray(self_probs), ref_self, rtol=2e-2, atol=5e-3)

    print("KERNEL_OK")
</pallas_src>

<mosaic_0001>
module attributes {stable_mosaic.version = 11 : i64} {
  func.func @decoder_layer_kernel(%arg0: memref<16x32xf32, #tpu.memory_space<vmem>>, %arg1: memref<20x32xf32, #tpu.memory_space<vmem>>, %arg2: memref<64x16xf32, #tpu.memory_space<vmem>>, %arg3: memref<512x128xf32, #tpu.memory_space<vmem>>, %arg4: memref<144x128xf32, #tpu.memory_space<vmem>>) attributes {dimension_semantics = [], scalar_prefetch = 0 : i64, scratch_operands = 0 : i64, tpu.core_type = #tpu.core_type<tc>} {
    %c0 = arith.constant 0 : index
    %c0_0 = arith.constant 0 : index
    %0 = vector.load %arg0[%c0, %c0_0] : memref<16x32xf32, #tpu.memory_space<vmem>>, vector<16x32xf32>
    %c0_1 = arith.constant 0 : index
    %c0_2 = arith.constant 0 : index
    %1 = vector.load %arg1[%c0_1, %c0_2] : memref<20x32xf32, #tpu.memory_space<vmem>>, vector<20x32xf32>
    %c0_3 = arith.constant 0 : index
    %c0_4 = arith.constant 0 : index
    %2 = vector.load %arg2[%c0_3, %c0_4] : memref<64x16xf32, #tpu.memory_space<vmem>>, vector<64x16xf32>
    %c0_5 = arith.constant 0 : index
    %c0_6 = arith.constant 0 : index
    %3 = vector.load %arg3[%c0_5, %c0_6] : memref<512x128xf32, #tpu.memory_space<vmem>>, vector<32x96xf32>
    %c32 = arith.constant 32 : index
    %c0_7 = arith.constant 0 : index
    %4 = vector.load %arg3[%c32, %c0_7] : memref<512x128xf32, #tpu.memory_space<vmem>>, vector<32x96xf32>
    %c64 = arith.constant 64 : index
    %c0_8 = arith.constant 0 : index
    %5 = vector.load %arg3[%c64, %c0_8] : memref<512x128xf32, #tpu.memory_space<vmem>>, vector<32x32xf32>
    %c96 = arith.constant 96 : index
    %c0_9 = arith.constant 0 : index
    %6 = vector.load %arg3[%c96, %c0_9] : memref<512x128xf32, #tpu.memory_space<vmem>>, vector<32x32xf32>
    %c128 = arith.constant 128 : index
    %c0_10 = arith.constant 0 : index
    %7 = vector.load %arg3[%c128, %c0_10] : memref<512x128xf32, #tpu.memory_space<vmem>>, vector<32x128xf32>
    %c160 = arith.constant 160 : index
    %c0_11 = arith.constant 0 : index
    %8 = vector.load %arg3[%c160, %c0_11] : memref<512x128xf32, #tpu.memory_space<vmem>>, vector<128x32xf32>
    %c288 = arith.constant 288 : index
    %c0_12 = arith.constant 0 : index
    %9 = vector.load %arg3[%c288, %c0_12] : memref<512x128xf32, #tpu.memory_space<vmem>>, vector<64x32xf32>
    %c352 = arith.constant 352 : index
    %c0_13 = arith.constant 0 : index
    %10 = vector.load %arg3[%c352, %c0_13] : memref<512x128xf32, #tpu.memory_space<vmem>>, vector<64x16xf32>
    %c416 = arith.constant 416 : index
    %c0_14 = arith.constant 0 : index
    %11 = vector.load %arg3[%c416, %c0_14] : memref<512x128xf32, #tpu.memory_space<vmem>>, vector<16x64xf32>
    %c432 = arith.constant 432 : index
    %c0_15 = arith.constant 0 : index
    %12 = vector.load %arg3[%c432, %c0_15] : memref<512x128xf32, #tpu.memory_space<vmem>>, vector<64x20xf32>
    %c496 = arith.constant 496 : index
    %c0_16 = arith.constant 0 : index
    %13 = vector.load %arg3[%c496, %c0_16] : memref<512x128xf32, #tpu.memory_space<vmem>>, vector<12x128xf32>
    %14 = vector.extract_strided_slice %13 {offsets = [0, 0], sizes = [1, 96], strides = [1, 1]} : vector<12x128xf32> to vector<1x96xf32>
    %15 = vector.extract_strided_slice %13 {offsets = [1, 0], sizes = [1, 96], strides = [1, 1]} : vector<12x128xf32> to vector<1x96xf32>
    %16 = vector.extract_strided_slice %13 {offsets = [2, 0], sizes = [1, 32], strides = [1, 1]} : vector<12x128xf32> to vector<1x32xf32>
    %17 = vector.extract_strided_slice %13 {offsets = [3, 0], sizes = [1, 32], strides = [1, 1]} : vector<12x128xf32> to vector<1x32xf32>
    %18 = vector.extract_strided_slice %13 {offsets = [4, 0], sizes = [1, 128], strides = [1, 1]} : vector<12x128xf32> to vector<1x128xf32>
    %19 = vector.extract_strided_slice %13 {offsets = [5, 0], sizes = [1, 32], strides = [1, 1]} : vector<12x128xf32> to vector<1x32xf32>
    %20 = vector.extract_strided_slice %13 {offsets = [6, 0], sizes = [1, 32], strides = [1, 1]} : vector<12x128xf32> to vector<1x32xf32>
    %21 = vector.extract_strided_slice %13 {offsets = [7, 0], sizes = [1, 32], strides = [1, 1]} : vector<12x128xf32> to vector<1x32xf32>
    %22 = vector.extract_strided_slice %13 {offsets = [8, 0], sizes = [1, 32], strides = [1, 1]} : vector<12x128xf32> to vector<1x32xf32>
    %23 = vector.extract_strided_slice %13 {offsets = [9, 0], sizes = [1, 32], strides = [1, 1]} : vector<12x128xf32> to vector<1x32xf32>
    %24 = vector.extract_strided_slice %13 {offsets = [10, 0], sizes = [1, 32], strides = [1, 1]} : vector<12x128xf32> to vector<1x32xf32>
    %25 = vector.extract_strided_slice %13 {offsets = [11, 0], sizes = [1, 32], strides = [1, 1]} : vector<12x128xf32> to vector<1x32xf32>
    %cst = arith.constant dense<0.000000e+00> : vector<16x96xf32>
    %26 = tpu.matmul %0, %3, %cst {dimension_numbers = #tpu.dot_dimension_numbers<[1], [0], [0], [1], [0, 0, 1, 1], [], []>} : vector<16x32xf32>, vector<32x96xf32>, vector<16x96xf32> -> vector<16x96xf32>
    %27 = vector.broadcast %14 : vector<1x96xf32> to vector<16x96xf32>
    %28 = arith.addf %26, %27 : vector<16x96xf32>
    %29 = vector.extract_strided_slice %28 {offsets = [0, 0], sizes = [16, 32], strides = [1, 1]} : vector<16x96xf32> to vector<16x32xf32>
    %30 = vector.extract_strided_slice %28 {offsets = [0, 32], sizes = [16, 32], strides = [1, 1]} : vector<16x96xf32> to vector<16x32xf32>
    %31 = vector.extract_strided_slice %28 {offsets = [0, 64], sizes = [16, 32], strides = [1, 1]} : vector<16x96xf32> to vector<16x32xf32>
    %cst_17 = arith.constant dense<0.000000e+00> : vector<64x32xf32>
    %32 = tpu.matmul %10, %29, %cst_17 {dimension_numbers = #tpu.dot_dimension_numbers<[1], [0], [0], [1], [0, 0, 1, 1], [], []>} : vector<64x16xf32>, vector<16x32xf32>, vector<64x32xf32> -> vector<64x32xf32>
    %33 = arith.mulf %32, %9 : vector<64x32xf32>
    %cst_18 = arith.constant dense<0.000000e+00> : vector<64x16xf32>
    %34 = tpu.matmul %33, %30, %cst_18 {dimension_numbers = #tpu.dot_dimension_numbers<[1], [1], [0], [0], [0, 0, 1, 0], [], []>} : vector<64x32xf32>, vector<16x32xf32>, vector<64x16xf32> -> vector<64x16xf32>
    %cst_19 = arith.constant 0.353553385 : f32
    %35 = vector.broadcast %cst_19 : f32 to vector<64x16xf32>
    %36 = arith.mulf %34, %35 : vector<64x16xf32>
    %37 = arith.addf %36, %2 : vector<64x16xf32>
    %cst_20 = arith.constant dense<0xFF800000> : vector<64xf32>
    %38 = vector.multi_reduction <maximumf>, %37, %cst_20 [1] : vector<64x16xf32> to vector<64xf32>
    %39 = vector.shape_cast %38 : vector<64xf32> to vector<64x1xf32>
    %40 = vector.broadcast %39 : vector<64x1xf32> to vector<64x16xf32>
    %41 = arith.subf %37, %40 : vector<64x16xf32>
    %42 = math.exp %41 : vector<64x16xf32>
    %cst_21 = arith.constant dense<0.000000e+00> : vector<64xf32>
    %43 = vector.multi_reduction <add>, %42, %cst_21 [1] : vector<64x16xf32> to vector<64xf32>
    %44 = vector.shape_cast %43 : vector<64xf32> to vector<64x1xf32>
    %45 = tpu.reciprocal %44 {approx = true} : vector<64x1xf32> -> vector<64x1xf32>
    %46 = vector.broadcast %45 : vector<64x1xf32> to vector<64x16xf32>
    %47 = arith.mulf %42, %46 : vector<64x16xf32>
    %cst_22 = arith.constant dense<0.000000e+00> : vector<64x32xf32>
    %48 = tpu.matmul %47, %31, %cst_22 {dimension_numbers = #tpu.dot_dimension_numbers<[1], [0], [0], [1], [0, 0, 1, 1], [], []>} : vector<64x16xf32>, vector<16x32xf32>, vector<64x32xf32> -> vector<64x32xf32>
    %49 = arith.mulf %48, %9 : vector<64x32xf32>
    %cst_23 = arith.constant dense<0.000000e+00> : vector<16x32xf32>
    %50 = tpu.matmul %11, %49, %cst_23 {dimension_numbers = #tpu.dot_dimension_numbers<[1], [0], [0], [1], [0, 0, 1, 1], [], []>} : vector<16x64xf32>, vector<64x32xf32>, vector<16x32xf32> -> vector<16x32xf32>
    %cst_24 = arith.constant dense<0.000000e+00> : vector<16x32xf32>
    %51 = tpu.matmul %50, %5, %cst_24 {dimension_numbers = #tpu.dot_dimension_numbers<[1], [0], [0], [1], [0, 0, 1, 1], [], []>} : vector<16x32xf32>, vector<32x32xf32>, vector<16x32xf32> -> vector<16x32xf32>
    %52 = vector.broadcast %16 : vector<1x32xf32> to vector<16x32xf32>
    %53 = arith.addf %51, %52 : vector<16x32xf32>
    %54 = arith.addf %0, %53 : vector<16x32xf32>
    %cst_25 = arith.constant dense<0.000000e+00> : vector<16xf32>
    %55 = vector.multi_reduction <add>, %54, %cst_25 [1] : vector<16x32xf32> to vector<16xf32>
    %56 = vector.shape_cast %55 : vector<16xf32> to vector<16x1xf32>
    %cst_26 = arith.constant 3.200000e+01 : f32
    %57 = vector.broadcast %cst_26 : f32 to vector<16x1xf32>
    %58 = arith.divf %56, %57 : vector<16x1xf32>
    %59 = vector.broadcast %58 : vector<16x1xf32> to vector<16x32xf32>
    %60 = arith.subf %54, %59 : vector<16x32xf32>
    %61 = arith.mulf %60, %60 : vector<16x32xf32>
    %cst_27 = arith.constant dense<0.000000e+00> : vector<16xf32>
    %62 = vector.multi_reduction <add>, %61, %cst_27 [1] : vector<16x32xf32> to vector<16xf32>
    %63 = vector.shape_cast %62 : vector<16xf32> to vector<16x1xf32>
    %cst_28 = arith.constant 3.200000e+01 : f32
    %64 = vector.broadcast %cst_28 : f32 to vector<16x1xf32>
    %65 = arith.divf %63, %64 : vector<16x1xf32>
    %66 = vector.broadcast %58 : vector<16x1xf32> to vector<16x32xf32>
    %67 = arith.subf %54, %66 : vector<16x32xf32>
    %cst_29 = arith.constant 9.99999974E-6 : f32
    %68 = vector.broadcast %cst_29 : f32 to vector<16x1xf32>
    %69 = arith.addf %65, %68 : vector<16x1xf32>
    %70 = math.rsqrt %69 : vector<16x1xf32>
    %71 = vector.broadcast %70 : vector<16x1xf32> to vector<16x32xf32>
    %72 = arith.mulf %67, %71 : vector<16x32xf32>
    %73 = vector.broadcast %20 : vector<1x32xf32> to vector<16x32xf32>
    %74 = arith.mulf %72, %73 : vector<16x32xf32>
    %75 = vector.broadcast %21 : vector<1x32xf32> to vector<16x32xf32>
    %76 = arith.addf %74, %75 : vector<16x32xf32>
    %77 = vector.extract_strided_slice %4 {offsets = [0, 0], sizes = [32, 32], strides = [1, 1]} : vector<32x96xf32> to vector<32x32xf32>
    %cst_30 = arith.constant dense<0.000000e+00> : vector<16x32xf32>
    %78 = tpu.matmul %76, %77, %cst_30 {dimension_numbers = #tpu.dot_dimension_numbers<[1], [0], [0], [1], [0, 0, 1, 1], [], []>} : vector<16x32xf32>, vector<32x32xf32>, vector<16x32xf32> -> vector<16x32xf32>
    %79 = vector.extract_strided_slice %15 {offsets = [0, 0], sizes = [1, 32], strides = [1, 1]} : vector<1x96xf32> to vector<1x32xf32>
    %80 = vector.broadcast %79 : vector<1x32xf32> to vector<16x32xf32>
    %81 = arith.addf %78, %80 : vector<16x32xf32>
    %82 = vector.extract_strided_slice %4 {offsets = [0, 32], sizes = [32, 64], strides = [1, 1]} : vector<32x96xf32> to vector<32x64xf32>
    %cst_31 = arith.constant dense<0.000000e+00> : vector<20x64xf32>
    %83 = tpu.matmul %1, %82, %cst_31 {dimension_numbers = #tpu.dot_dimension_numbers<[1], [0], [0], [1], [0, 0, 1, 1], [], []>} : vector<20x32xf32>, vector<32x64xf32>, vector<20x64xf32> -> vector<20x64xf32>
    %84 = vector.extract_strided_slice %15 {offsets = [0, 32], sizes = [1, 64], strides = [1, 1]} : vector<1x96xf32> to vector<1x64xf32>
    %85 = vector.broadcast %84 : vector<1x64xf32> to vector<20x64xf32>
    %86 = arith.addf %83, %85 : vector<20x64xf32>
    %87 = vector.extract_strided_slice %86 {offsets = [0, 0], sizes = [20, 32], strides = [1, 1]} : vector<20x64xf32> to vector<20x32xf32>
    %88 = vector.extract_strided_slice %86 {offsets = [0, 32], sizes = [20, 32], strides = [1, 1]} : vector<20x64xf32> to vector<20x32xf32>
    %cst_32 = arith.constant dense<0.000000e+00> : vector<64x32xf32>
    %89 = tpu.matmul %10, %81, %cst_32 {dimension_numbers = #tpu.dot_dimension_numbers<[1], [0], [0], [1], [0, 0, 1, 1], [], []>} : vector<64x16xf32>, vector<16x32xf32>, vector<64x32xf32> -> vector<64x32xf32>
    %90 = arith.mulf %89, %9 : vector<64x32xf32>
    %cst_33 = arith.constant dense<0.000000e+00> : vector<64x20xf32>
    %91 = tpu.matmul %90, %87, %cst_33 {dimension_numbers = #tpu.dot_dimension_numbers<[1], [1], [0], [0], [0, 0, 1, 0], [], []>} : vector<64x32xf32>, vector<20x32xf32>, vector<64x20xf32> -> vector<64x20xf32>
    %cst_34 = arith.constant 0.353553385 : f32
    %92 = vector.broadcast %cst_34 : f32 to vector<64x20xf32>
    %93 = arith.mulf %91, %92 : vector<64x20xf32>
    %94 = arith.addf %93, %12 : vector<64x20xf32>
    %cst_35 = arith.constant dense<0xFF800000> : vector<64xf32>
    %95 = vector.multi_reduction <maximumf>, %94, %cst_35 [1] : vector<64x20xf32> to vector<64xf32>
    %96 = vector.shape_cast %95 : vector<64xf32> to vector<64x1xf32>
    %97 = vector.broadcast %96 : vector<64x1xf32> to vector<64x20xf32>
    %98 = arith.subf %94, %97 : vector<64x20xf32>
    %99 = math.exp %98 : vector<64x20xf32>
    %cst_36 = arith.constant dense<0.000000e+00> : vector<64xf32>
    %100 = vector.multi_reduction <add>, %99, %cst_36 [1] : vector<64x20xf32> to vector<64xf32>
    %101 = vector.shape_cast %100 : vector<64xf32> to vector<64x1xf32>
    %102 = tpu.reciprocal %101 {approx = true} : vector<64x1xf32> -> vector<64x1xf32>
    %103 = vector.broadcast %102 : vector<64x1xf32> to vector<64x20xf32>
    %104 = arith.mulf %99, %103 : vector<64x20xf32>
    %cst_37 = arith.constant dense<0.000000e+00> : vector<64x32xf32>
    %105 = tpu.matmul %104, %88, %cst_37 {dimension_numbers = #tpu.dot_dimension_numbers<[1], [0], [0], [1], [0, 0, 1, 1], [], []>} : vector<64x20xf32>, vector<20x32xf32>, vector<64x32xf32> -> vector<64x32xf32>
    %106 = arith.mulf %105, %9 : vector<64x32xf32>
    %cst_38 = arith.constant dense<0.000000e+00> : vector<16x32xf32>
    %107 = tpu.matmul %11, %106, %cst_38 {dimension_numbers = #tpu.dot_dimension_numbers<[1], [0], [0], [1], [0, 0, 1, 1], [], []>} : vector<16x64xf32>, vector<64x32xf32>, vector<16x32xf32> -> vector<16x32xf32>
    %cst_39 = arith.constant dense<0.000000e+00> : vector<16x32xf32>
    %108 = tpu.matmul %107, %6, %cst_39 {dimension_numbers = #tpu.dot_dimension_numbers<[1], [0], [0], [1], [0, 0, 1, 1], [], []>} : vector<16x32xf32>, vector<32x32xf32>, vector<16x32xf32> -> vector<16x32xf32>
    %109 = vector.broadcast %17 : vector<1x32xf32> to vector<16x32xf32>
    %110 = arith.addf %108, %109 : vector<16x32xf32>
    %111 = arith.addf %76, %110 : vector<16x32xf32>
    %cst_40 = arith.constant dense<0.000000e+00> : vector<16xf32>
    %112 = vector.multi_reduction <add>, %111, %cst_40 [1] : vector<16x32xf32> to vector<16xf32>
    %113 = vector.shape_cast %112 : vector<16xf32> to vector<16x1xf32>
    %cst_41 = arith.constant 3.200000e+01 : f32
    %114 = vector.broadcast %cst_41 : f32 to vector<16x1xf32>
    %115 = arith.divf %113, %114 : vector<16x1xf32>
    %116 = vector.broadcast %115 : vector<16x1xf32> to vector<16x32xf32>
    %117 = arith.subf %111, %116 : vector<16x32xf32>
    %118 = arith.mulf %117, %117 : vector<16x32xf32>
    %cst_42 = arith.constant dense<0.000000e+00> : vector<16xf32>
    %119 = vector.multi_reduction <add>, %118, %cst_42 [1] : vector<16x32xf32> to vector<16xf32>
    %120 = vector.shape_cast %119 : vector<16xf32> to vector<16x1xf32>
    %cst_43 = arith.constant 3.200000e+01 : f32
    %121 = vector.broadcast %cst_43 : f32 to vector<16x1xf32>
    %122 = arith.divf %120, %121 : vector<16x1xf32>
    %123 = vector.broadcast %115 : vector<16x1xf32> to vector<16x32xf32>
    %124 = arith.subf %111, %123 : vector<16x32xf32>
    %cst_44 = arith.constant 9.99999974E-6 : f32
    %125 = vector.broadcast %cst_44 : f32 to vector<16x1xf32>
    %126 = arith.addf %122, %125 : vector<16x1xf32>
    %127 = math.rsqrt %126 : vector<16x1xf32>
    %128 = vector.broadcast %127 : vector<16x1xf32> to vector<16x32xf32>
    %129 = arith.mulf %124, %128 : vector<16x32xf32>
    %130 = vector.broadcast %22 : vector<1x32xf32> to vector<16x32xf32>
    %131 = arith.mulf %129, %130 : vector<16x32xf32>
    %132 = vector.broadcast %23 : vector<1x32xf32> to vector<16x32xf32>
    %133 = arith.addf %131, %132 : vector<16x32xf32>
    %cst_45 = arith.constant dense<0.000000e+00> : vector<16x128xf32>
    %134 = tpu.matmul %133, %7, %cst_45 {dimension_numbers = #tpu.dot_dimension_numbers<[1], [0], [0], [1], [0, 0, 1, 1], [], []>} : vector<16x32xf32>, vector<32x128xf32>, vector<16x128xf32> -> vector<16x128xf32>
    %135 = vector.broadcast %18 : vector<1x128xf32> to vector<16x128xf32>
    %136 = arith.addf %134, %135 : vector<16x128xf32>
    %cst_46 = arith.constant 0.000000e+00 : f32
    %137 = vector.broadcast %cst_46 : f32 to vector<16x128xf32>
    %138 = arith.maximumf %136, %137 : vector<16x128xf32>
    %cst_47 = arith.constant dense<0.000000e+00> : vector<16x32xf32>
    %139 = tpu.matmul %138, %8, %cst_47 {dimension_numbers = #tpu.dot_dimension_numbers<[1], [0], [0], [1], [0, 0, 1, 1], [], []>} : vector<16x128xf32>, vector<128x32xf32>, vector<16x32xf32> -> vector<16x32xf32>
    %140 = vector.broadcast %19 : vector<1x32xf32> to vector<16x32xf32>
    %141 = arith.addf %139, %140 : vector<16x32xf32>
    %142 = arith.addf %133, %141 : vector<16x32xf32>
    %cst_48 = arith.constant dense<0.000000e+00> : vector<16xf32>
    %143 = vector.multi_reduction <add>, %142, %cst_48 [1] : vector<16x32xf32> to vector<16xf32>
    %144 = vector.shape_cast %143 : vector<16xf32> to vector<16x1xf32>
    %cst_49 = arith.constant 3.200000e+01 : f32
    %145 = vector.broadcast %cst_49 : f32 to vector<16x1xf32>
    %146 = arith.divf %144, %145 : vector<16x1xf32>
    %147 = vector.broadcast %146 : vector<16x1xf32> to vector<16x32xf32>
    %148 = arith.subf %142, %147 : vector<16x32xf32>
    %149 = arith.mulf %148, %148 : vector<16x32xf32>
    %cst_50 = arith.constant dense<0.000000e+00> : vector<16xf32>
    %150 = vector.multi_reduction <add>, %149, %cst_50 [1] : vector<16x32xf32> to vector<16xf32>
    %151 = vector.shape_cast %150 : vector<16xf32> to vector<16x1xf32>
    %cst_51 = arith.constant 3.200000e+01 : f32
    %152 = vector.broadcast %cst_51 : f32 to vector<16x1xf32>
    %153 = arith.divf %151, %152 : vector<16x1xf32>
    %154 = vector.broadcast %146 : vector<16x1xf32> to vector<16x32xf32>
    %155 = arith.subf %142, %154 : vector<16x32xf32>
    %cst_52 = arith.constant 9.99999974E-6 : f32
    %156 = vector.broadcast %cst_52 : f32 to vector<16x1xf32>
    %157 = arith.addf %153, %156 : vector<16x1xf32>
    %158 = math.rsqrt %157 : vector<16x1xf32>
    %159 = vector.broadcast %158 : vector<16x1xf32> to vector<16x32xf32>
    %160 = arith.mulf %155, %159 : vector<16x32xf32>
    %161 = vector.broadcast %24 : vector<1x32xf32> to vector<16x32xf32>
    %162 = arith.mulf %160, %161 : vector<16x32xf32>
    %163 = vector.broadcast %25 : vector<1x32xf32> to vector<16x32xf32>
    %164 = arith.addf %162, %163 : vector<16x32xf32>
    %c0_53 = arith.constant 0 : index
    %c0_54 = arith.constant 0 : index
    %165 = vector.load %arg4[%c0_53, %c0_54] : memref<144x128xf32, #tpu.memory_space<vmem>>, vector<64x16xf32>
    tpu.vector_store %arg4[%c0_53, %c0_54], %47 {strides = array<i32>} : memref<144x128xf32, #tpu.memory_space<vmem>>, vector<64x16xf32>,
    %c64_55 = arith.constant 64 : index
    %c0_56 = arith.constant 0 : index
    %166 = vector.load %arg4[%c64_55, %c0_56] : memref<144x128xf32, #tpu.memory_space<vmem>>, vector<64x20xf32>
    tpu.vector_store %arg4[%c64_55, %c0_56], %104 {strides = array<i32>} : memref<144x128xf32, #tpu.memory_space<vmem>>, vector<64x20xf32>,
    %c128_57 = arith.constant 128 : index
    %c0_58 = arith.constant 0 : index
    %167 = vector.load %arg4[%c128_57, %c0_58] : memref<144x128xf32, #tpu.memory_space<vmem>>, vector<16x32xf32>
    tpu.vector_store %arg4[%c128_57, %c0_58], %164 {strides = array<i32>} : memref<144x128xf32, #tpu.memory_space<vmem>>, vector<16x32xf32>,
    return
  }
}

</mosaic_0001>

<bundles_post_ra>
// kernel: decoder_layer.1
= control target key start
LH: loop header
LB: loop body
LE: loop exit
PB: predicated region body
PF: predicated region fallthrough
CT: control target
= control target key end

     0   :  { %9 = vsyncpa [#allocation3], 0  ;;  %s1451_s18 = smov [#allocation2]   ;;  %s1452_s20 = smov 128   ;;  %s1891_s0 = inlined_call_operand.vmem [shape: f32[16,32], index: 0, kind: input, shape index: {}]   ;;  %s1892_s1 = inlined_call_operand.vmem [shape: f32[20,32], index: 1, kind: input, shape index: {}]   ;;  %s1893_s2 = inlined_call_operand.vmem [shape: f32[64,16], index: 2, kind: input, shape index: {}]   ;;  %s1894_s3 = inlined_call_operand.hbm [shape: f32[512,128], index: 3, kind: input, shape index: {}]   ;;  %s1895_s4 = inlined_call_operand.vmem [shape: f32[144,128], index: 4, kind: output, shape index: {}]  }
   0x1   :  { %s20_s17 = sshll.u32 %s1894_s3, 4  ;;  %s22_s19 = sshll.u32 %s1451_s18, 4  ;;  %s21_s17 = int_to_ptr.hbm [resolvable:$true] %s20_s17  ;;  %s23_s19 = int_to_ptr.vmem [resolvable:$true] %s22_s19 }
   0x2   :  { %s1453_s21 = smov 8  }
   0x3   :  { %28 = dma.hbm_to_vmem [thread:$0]  %s21_s17, 8192, %s23_s19, [#allocation3], %s1452_s20, %s1452_s20, %s1453_s21  }
   0x4   :  { %1449 = dma.done.wait [#allocation3], 8192  }
   0x5   :  { %1450 = vsyncadd [#allocation3], 4294959104  ;;  %v49_v0 = vld [vmem:[#allocation2 + $0x18] sm:$0xff]  ;;  %v48_v1 = vld [vmem:[#allocation2 + $0x10] sm:$0xff]  ;;  %vm111_vm0 = vcmask 261120   ;;  %s1454_s25 = smov 96  }
   0x6   :  { %130 = vmatpush.msra.mxu0 %v49_v0  ;;  %v47_v2 = vld [vmem:[#allocation2 + $0x8] sm:$0xff]  ;;  %v46_v3 = vld [vmem:[#allocation2] sm:$0xff]  ;;  %v1499_v7 = vld [vmem:[#allocation2 + $0x1f0] sm:$0xff]  ;;  %vm141_vm1 = vcmask 130048   ;;  %vm473_vm2 = vcmask 523264   ;;  %vm816_vm10 = vcmask 162816  }
   0x7   :  { %v1488_v4 = vld [vmem:[%s1891_s0] sm:$0xff]  ;;  %v1495_v5 = vld [vmem:[%s1891_s0 + $0x8] sm:$0xff]  ;;  %v110_v8 = vperm.slane %v1499_v7, 0  ;;  %v1522_v15 = vld [vmem:[#allocation2 + $0x170] sm:$0xff]  ;;  %vm937_vm11 = vcmask 1043456  }
   0x8   :  { %131 = vmatpush.msra.mxu0 %v48_v1  ;;  %v1509_v12 = vld [vmem:[#allocation2 + $0x160] sm:$0xff]  ;;  %v1518_v14 = vld [vmem:[#allocation2 + $0x168] sm:$0xff]  ;;  %v1526_v16 = vld [vmem:[#allocation2 + $0x178] sm:$0xff] }
   0x9   :  { %v1530_v17 = vld [vmem:[#allocation2 + $0x180] sm:$0xff]  ;;  %v1534_v18 = vld [vmem:[#allocation2 + $0x188] sm:$0xff]  ;;  %v1538_v19 = vld [vmem:[#allocation2 + $0x190] sm:$0xff] }
   0xa   :  { %132 = vmatpush.msra.mxu0 %v47_v2  ;;  %v1542_v20 = vld [vmem:[#allocation2 + $0x198] sm:$0xff]  ;;  %v1548_v23 = vld [vmem:[#allocation2 + $0x120] sm:$0xff]  ;;  %v1552_v26 = vld [vmem:[#allocation2 + $0x128] sm:$0xff] }
   0xb   :  { %v1556_v29 = vld [vmem:[#allocation2 + $0x130] sm:$0xff]  ;;  %v1560_v32 = vld [vmem:[#allocation2 + $0x138] sm:$0xff]  ;;  %v1564_v35 = vld [vmem:[#allocation2 + $0x140] sm:$0xff] }
   0xc   :  { %133 = vmatpush.msra.mxu0 %v46_v3  ;;  %v1568_v38 = vld [vmem:[#allocation2 + $0x148] sm:$0xff]  ;;  %v1572_v41 = vld [vmem:[#allocation2 + $0x150] sm:$0xff]  ;;  %v1576_v44 = vld [vmem:[#allocation2 + $0x158] sm:$0xff] }
   0xd   :  { %1225 = vmatmul.msk.f32.vlgmr.msra.gmra.mxu0 %vm111_vm0, %v1488_v4  ;;  %v38_v48 = vld [vmem:[%s1893_s2] sm:$0xff]  ;;  %v39_v53 = vld [vmem:[%s1893_s2 + $0x8] sm:$0xff]  ;;  %v40_v58 = vld [vmem:[%s1893_s2 + $0x10] sm:$0xff] }
   0xe   :  { %v41_v63 = vld [vmem:[%s1893_s2 + $0x18] sm:$0xff] }
  0x15   :  { %1226 = vmatmul.msk.f32.gmra.mxu0 %vm111_vm0, %v1495_v5 }
  0x8a   :  { %v135_v6 = vpop.f32.mrf.mxu0 }
  0x8b   :  { %v1502_v10 = vadd.f32 %v135_v6, %v110_v8  ;;  %v42_v6 = vld [vmem:[%s1893_s2 + $0x20] sm:$0xff] }
  0x92   :  { %v138_v9 = vpop.f32.mrf.mxu0 }
  0x93   :  { %v1504_v11 = vadd.f32 %v138_v9, %v110_v8 }
  0x95   :  { %219 = vrot.lane.b32.xlu0 %v1504_v11, %s1454_s25  ;;  %180 = vmatpush.msra.mxu1 %v1504_v11  ;;  %v1318_v13 = vpack.i.bf16 %v1502_v10, %v1504_v11 }
  0x97   :  { %181 = vmatpush.msra.mxu1 %v1502_v10 }
  0x98   :  { %1227 = vmatmul.msk.f32.vlgmr.msra.gmra.mxu1 %vm141_vm1, %v1509_v12 }
  0x9d   :  { %217 = vrot.lane.b32.xlu0 %v1502_v10, %s1454_s25 }
  0xa0   :  { %1228 = vmatmul.msk.f32.gmra.mxu1 %vm141_vm1, %v1518_v14 }
  0xa8   :  { %1229 = vmatmul.msk.f32.gmra.mxu1 %vm141_vm1, %v1522_v15 }
  0xb0   :  { %1230 = vmatmul.msk.f32.gmra.mxu1 %vm141_vm1, %v1526_v16 }
  0xb8   :  { %1231 = vmatmul.msk.f32.gmra.mxu1 %vm141_vm1, %v1530_v17 }
  0xc0   :  { %1232 = vmatmul.msk.f32.gmra.mxu1 %vm141_vm1, %v1534_v18 }
  0xc8   :  { %1233 = vmatmul.msk.f32.gmra.mxu1 %vm141_vm1, %v1538_v19 }
  0xd0   :  { %1234 = vmatmul.msk.f32.gmra.mxu1 %vm141_vm1, %v1542_v20 }
 0x107   :  { %v220_v21 = vpop.permute.xlu0 %219 }
 0x108   :  { %1235 = vmatpush.xpose.msk.msra.mxu2 %vm111_vm0, %v220_v21 }
 0x10f   :  { %v218_v22 = vpop.permute.xlu0 %217 }
 0x110   :  { %1236 = vmatpush.xpose.msk.msra.mxu2 %vm111_vm0, %v218_v22 }
 0x115   :  { %v183_v24 = vpop.f32.mrf.mxu1 }
 0x116   :  { %v207_v25 = vmul.f32 %v183_v24, %v1548_v23  ;;  %v43_v24 = vld [vmem:[%s1893_s2 + $0x28] sm:$0xff] }
 0x118   :  { %1237 = vmatmul.msk.f32.vlgmr.msra.gmra.mxu2 %vm111_vm0, %v207_v25 }
 0x11d   :  { %v186_v27 = vpop.f32.mrf.mxu1 }
 0x11e   :  { %v208_v28 = vmul.f32 %v186_v27, %v1552_v26 }
 0x120   :  { %1238 = vmatmul.msk.f32.gmra.mxu2 %vm111_vm0, %v208_v28 }
 0x125   :  { %v189_v30 = vpop.f32.mrf.mxu1 }
 0x126   :  { %v209_v31 = vmul.f32 %v189_v30, %v1556_v29 }
 0x128   :  { %1239 = vmatmul.msk.f32.gmra.mxu2 %vm111_vm0, %v209_v31  ;;  %v44_v31 = vld [vmem:[%s1893_s2 + $0x30] sm:$0xff] }
 0x12d   :  { %v192_v33 = vpop.f32.mrf.mxu1 }
 0x12e   :  { %v210_v34 = vmul.f32 %v192_v33, %v1560_v32 }
 0x130   :  { %1240 = vmatmul.msk.f32.gmra.mxu2 %vm111_vm0, %v210_v34 }
 0x135   :  { %v195_v36 = vpop.f32.mrf.mxu1 }
 0x136   :  { %v211_v37 = vmul.f32 %v195_v36, %v1564_v35 }
 0x138   :  { %1241 = vmatmul.msk.f32.gmra.mxu2 %vm111_vm0, %v211_v37 }
 0x13d   :  { %v198_v39 = vpop.f32.mrf.mxu1 }
 0x13e   :  { %v212_v40 = vmul.f32 %v198_v39, %v1568_v38  ;;  %v45_v39 = vld [vmem:[%s1893_s2 + $0x38] sm:$0xff]  ;;  %s1455_s2 = smov 64  }
 0x140   :  { %1242 = vmatmul.msk.f32.gmra.mxu2 %vm111_vm0, %v212_v40 }
 0x145   :  { %v201_v42 = vpop.f32.mrf.mxu1 }
 0x146   :  { %v213_v43 = vmul.f32 %v201_v42, %v1572_v41 }
 0x148   :  { %1243 = vmatmul.msk.f32.gmra.mxu2 %vm111_vm0, %v213_v43 }
 0x14d   :  { %v204_v45 = vpop.f32.mrf.mxu1 }
 0x14e   :  { %v214_v46 = vmul.f32 %v204_v45, %v1576_v44 }
 0x150   :  { %1244 = vmatmul.msk.f32.gmra.mxu2 %vm111_vm0, %v214_v46 }
 0x19b   :  { %v266_v47 = vpop.f32.mrf.mxu2 }
 0x19c   :  { %v290_v49 = vmul.f32 0.35355338, %v266_v47 }
 0x19e   :  { %v298_v50 = vadd.f32 %v290_v49, %v38_v48 }
 0x1a0   :  { %v306_v51 = vsel %vm141_vm1, %v298_v50, -inf }
 0x1a1   :  { %307 = vmax.xlane.f32.xlu1 %v306_v51 }
 0x1a3   :  { %v269_v52 = vpop.f32.mrf.mxu2 }
 0x1a4   :  { %v291_v54 = vmul.f32 0.35355338, %v269_v52 }
 0x1a6   :  { %v299_v55 = vadd.f32 %v291_v54, %v39_v53 }
 0x1a8   :  { %v309_v56 = vsel %vm141_vm1, %v299_v55, -inf }
 0x1a9   :  { %310 = vmax.xlane.f32.xlu1 %v309_v56 }
 0x1ab   :  { %v272_v57 = vpop.f32.mrf.mxu2 }
 0x1ac   :  { %v292_v59 = vmul.f32 0.35355338, %v272_v57 }
 0x1ae   :  { %v300_v60 = vadd.f32 %v292_v59, %v40_v58 }
 0x1b0   :  { %v312_v61 = vsel %vm141_vm1, %v300_v60, -inf }
 0x1b1   :  { %313 = vmax.xlane.f32.xlu2 %v312_v61 }
 0x1b3   :  { %v275_v62 = vpop.f32.mrf.mxu2 }
 0x1b4   :  { %v293_v0 = vmul.f32 0.35355338, %v275_v62 }
 0x1b6   :  { %v301_v1 = vadd.f32 %v293_v0, %v41_v63 }
 0x1b8   :  { %v315_v2 = vsel %vm141_vm1, %v301_v1, -inf }
 0x1b9   :  { %316 = vmax.xlane.f32.xlu2 %v315_v2 }
 0x1bb   :  { %v278_v3 = vpop.f32.mrf.mxu2 }
 0x1bc   :  { %v294_v8 = vmul.f32 0.35355338, %v278_v3 }
 0x1be   :  { %v302_v9 = vadd.f32 %v294_v8, %v42_v6 }
 0x1c0   :  { %v318_v21 = vsel %vm141_vm1, %v302_v9, -inf }
 0x1c1   :  { %319 = vmax.xlane.f32.xlu0 %v318_v21 }
 0x1c3   :  { %v281_v22 = vpop.f32.mrf.mxu2 }
 0x1c4   :  { %v295_v25 = vmul.f32 0.35355338, %v281_v22 }
 0x1c6   :  { %v1603_v27 = vadd.f32 %v295_v25, %v43_v24 }
 0x1c8   :  { %v321_v28 = vsel %vm141_vm1, %v1603_v27, -inf }
 0x1c9   :  { %322 = vmax.xlane.f32.xlu1 %v321_v28 }
 0x1cb   :  { %v284_v30 = vpop.f32.mrf.mxu2 }
 0x1cc   :  { %v296_v33 = vmul.f32 0.35355338, %v284_v30 }
 0x1ce   :  { %v304_v34 = vadd.f32 %v296_v33, %v44_v31 }
 0x1d0   :  { %v324_v36 = vsel %vm141_vm1, %v304_v34, -inf }
 0x1d1   :  { %325 = vmax.xlane.f32.xlu2 %v324_v36 }
 0x1d3   :  { %v287_v37 = vpop.f32.mrf.mxu2 }
 0x1d4   :  { %v297_v40 = vmul.f32 0.35355338, %v287_v37 }
 0x1d6   :  { %v305_v42 = vadd.f32 %v297_v40, %v45_v39 }
 0x1d8   :  { %v327_v43 = vsel %vm141_vm1, %v305_v42, -inf }
 0x1d9   :  { %328 = vmax.xlane.f32.xlu2 %v327_v43 }
 0x214   :  { %v308_v45 = vpop.xlane.xlu1 %307 }
 0x215   :  { %v330_v46 = vsub.f32 %v298_v50, %v308_v45 }
 0x217   :  { %v338_v47 = vmul.f32 1.442695, %v330_v46 }
 0x219   :  { %1338 = vpow2.f32 %v338_v47 }
 0x21c   :  { %v311_v48 = vpop.xlane.xlu1 %310 }
 0x21d   :  { %v331_v49 = vsub.f32 %v299_v55, %v311_v48 }
 0x21f   :  { %v1339_v51 = vpop.eup %1338  ;;  %v340_v52 = vmul.f32 1.442695, %v331_v49 }
 0x220   :  { %v354_v53 = vsel %vm141_vm1, %v1339_v51, 0.0 }
 0x221   :  { %1340 = vpow2.f32 %v340_v52  ;;  %355 = vadd.xlane.f32.xlu1 %v354_v53 }
 0x224   :  { %v314_v54 = vpop.xlane.xlu2 %313 }
 0x225   :  { %v332_v56 = vsub.f32 %v300_v60, %v314_v54 }
 0x227   :  { %v1341_v57 = vpop.eup %1340  ;;  %v342_v58 = vmul.f32 1.442695, %v332_v56 }
 0x228   :  { %v357_v59 = vsel %vm141_vm1, %v1341_v57, 0.0 }
 0x229   :  { %1342 = vpow2.f32 %v342_v58  ;;  %358 = vadd.xlane.f32.xlu2 %v357_v59 }
 0x22c   :  { %v317_v61 = vpop.xlane.xlu2 %316 }
 0x22d   :  { %v333_v50 = vsub.f32 %v301_v1, %v317_v61 }
 0x22f   :  { %v1343_v62 = vpop.eup %1342  ;;  %v344_v63 = vmul.f32 1.442695, %v333_v50 }
 0x230   :  { %v360_v55 = vsel %vm141_vm1, %v1343_v62, 0.0 }
 0x231   :  { %1344 = vpow2.f32 %v344_v63  ;;  %361 = vadd.xlane.f32.xlu2 %v360_v55 }
 0x234   :  { %v320_v0 = vpop.xlane.xlu0 %319 }
 0x235   :  { %v334_v2 = vsub.f32 %v302_v9, %v320_v0 }
 0x237   :  { %v1345_v3 = vpop.eup %1344  ;;  %v346_v6 = vmul.f32 1.442695, %v334_v2 }
 0x238   :  { %v363_v60 = vsel %vm141_vm1, %v1345_v3, 0.0 }
 0x239   :  { %1346 = vpow2.f32 %v346_v6  ;;  %364 = vadd.xlane.f32.xlu2 %v363_v60 }
 0x23a   :  { %1319 = vrot.lane.b32.xlu1 %v1318_v13, %s1455_s2 }
 0x23c   :  { %v323_v30 = vpop.xlane.xlu1 %322 }
 0x23d   :  { %v335_v10 = vsub.f32 %v1603_v27, %v323_v30 }
 0x23f   :  { %v1347_v1 = vpop.eup %1346  ;;  %v348_v11 = vmul.f32 1.442695, %v335_v10 }
 0x240   :  { %v366_v8 = vsel %vm141_vm1, %v1347_v1, 0.0 }
 0x241   :  { %367 = vadd.xlane.f32.xlu2 %v366_v8 }
 0x244   :  { %v326_v21 = vpop.xlane.xlu2 %325 }
 0x245   :  { %v336_v22 = vsub.f32 %v304_v34, %v326_v21 }
 0x247   :  { %v350_v24 = vmul.f32 1.442695, %v336_v22 }
 0x249   :  { %1348 = vpow2.f32 %v350_v24 }
 0x24c   :  { %v329_v9 = vpop.xlane.xlu2 %328 }
 0x24d   :  { %v337_v25 = vsub.f32 %v305_v42, %v329_v9 }
 0x24f   :  { %v1349_v28 = vpop.eup %1348  ;;  %v352_v31 = vmul.f32 1.442695, %v337_v25 }
 0x250   :  { %v372_v33 = vsel %vm141_vm1, %v1349_v28, 0.0 }
 0x251   :  { %1350 = vpow2.f32 %v352_v31  ;;  %373 = vadd.xlane.f32.xlu0 %v372_v33 }
 0x252   :  { %1352 = vpow2.f32 %v348_v11 }
 0x257   :  { %v1351_v13 = vpop.eup %1350 }
 0x258   :  { %v375_v36 = vsel %vm141_vm1, %v1351_v13, 0.0  ;;  %v1353_v34 = vpop.eup %1352 }
 0x259   :  { %376 = vadd.xlane.f32.xlu2 %v375_v36  ;;  %v369_v37 = vsel %vm141_vm1, %v1353_v34, 0.0 }
 0x264   :  { %370 = vadd.xlane.f32.xlu1 %v369_v37  ;;  %v57_v37 = vld [vmem:[#allocation2 + $0x58] sm:$0xff] }
 0x294   :  { %v356_v39 = vpop.xlane.xlu1 %355 }
 0x295   :  { %1354 = vrcp.f32 %v356_v39  ;;  %v56_v39 = vld [vmem:[#allocation2 + $0x50] sm:$0xff] }
 0x29b   :  { %v1355_v40 = vpop.eup %1354 }
 0x29c   :  { %v359_v42 = vpop.xlane.xlu2 %358  ;;  %v386_v43 = vmul.f32 %v1355_v40, %v1339_v51  ;;  %v55_v40 = vld [vmem:[#allocation2 + $0x48] sm:$0xff] }
 0x29d   :  { %1356 = vrcp.f32 %v359_v42  ;;  %v1679_v42 = vld [vmem:[#allocation2 + $0x1a8] sm:$0xff] }
 0x29e   :  { %1202 = vst.msk [vmem:[%s1895_s4] sm:$0xff] %vm141_vm1, %v386_v43 }
 0x2a3   :  { %v1357_v27 = vpop.eup %1356 }
 0x2a4   :  { %v362_v45 = vpop.xlane.xlu2 %361  ;;  %v387_v46 = vmul.f32 %v1357_v27, %v1341_v57 }
 0x2a5   :  { %1358 = vrcp.f32 %v362_v45 }
 0x2a6   :  { %1203 = vst.msk [vmem:[%s1895_s4 + $0x8] sm:$0xff] %vm141_vm1, %v387_v46 }
 0x2ab   :  { %v1359_v47 = vpop.eup %1358 }
 0x2ac   :  { %v1320_v48 = vpop.permute.xlu1 %1319  ;;  %v365_v49 = vpop.xlane.xlu2 %364  ;;  %v388_v52 = vmul.f32 %v1359_v47, %v1343_v62 }
 0x2ad   :  { %1360 = vrcp.f32 %v365_v49  ;;  %v1321_v51 = vunpack.i.l.bf16 %v1320_v48  ;;  %v1322_v53 = vunpack.i.h.bf16 %v1320_v48 }
 0x2ae   :  { %1204 = vst.msk [vmem:[%s1895_s4 + $0x10] sm:$0xff] %vm141_vm1, %v388_v52 }
 0x2af   :  { %438 = vmatpush.msra.mxu3 %v1321_v51 }
 0x2b1   :  { %439 = vmatpush.msra.mxu3 %v1322_v53 }
 0x2b2   :  { %1245 = vmatmul.msk.f32.vlgmr.msra.gmra.mxu3 %vm141_vm1, %v386_v43  ;;  %v54_v43 = vld [vmem:[#allocation2 + $0x40] sm:$0xff] }
 0x2b3   :  { %v1361_v54 = vpop.eup %1360 }
 0x2b4   :  { %v368_v56 = vpop.xlane.xlu2 %367  ;;  %v389_v57 = vmul.f32 %v1361_v54, %v1345_v3 }
 0x2b5   :  { %1362 = vrcp.f32 %v368_v56 }
 0x2b6   :  { %1205 = vst.msk [vmem:[%s1895_s4 + $0x18] sm:$0xff] %vm141_vm1, %v389_v57 }
 0x2ba   :  { %1246 = vmatmul.msk.f32.gmra.mxu3 %vm141_vm1, %v387_v46  ;;  %v503_v46 = vperm.slane %v1499_v7, 2 }
 0x2bb   :  { %v1363_v58 = vpop.eup %1362 }
 0x2bc   :  { %v390_v59 = vmul.f32 %v1363_v58, %v1347_v1 }
 0x2be   :  { %1206 = vst.msk [vmem:[%s1895_s4 + $0x20] sm:$0xff] %vm141_vm1, %v390_v59 }
 0x2c2   :  { %1247 = vmatmul.msk.f32.gmra.mxu3 %vm141_vm1, %v388_v52 }
 0x2c4   :  { %v374_v61 = vpop.xlane.xlu0 %373 }
 0x2c5   :  { %1364 = vrcp.f32 %v374_v61 }
 0x2ca   :  { %1248 = vmatmul.msk.f32.gmra.mxu3 %vm141_vm1, %v389_v57  ;;  %v1456_v57 = vmov 32.0  }
 0x2cb   :  { %v1365_v50 = vpop.eup %1364 }
 0x2cc   :  { %v377_v62 = vpop.xlane.xlu2 %376  ;;  %v392_v63 = vmul.f32 %v1365_v50, %v1349_v28 }
 0x2cd   :  { %1366 = vrcp.f32 %v377_v62 }
 0x2ce   :  { %1208 = vst.msk [vmem:[%s1895_s4 + $0x30] sm:$0xff] %vm141_vm1, %v392_v63 }
 0x2d2   :  { %1249 = vmatmul.msk.f32.gmra.mxu3 %vm141_vm1, %v390_v59 }
 0x2d3   :  { %v1367_v55 = vpop.eup %1366 }
 0x2d4   :  { %v393_v0 = vmul.f32 %v1367_v55, %v1351_v13 }
 0x2d6   :  { %1209 = vst.msk [vmem:[%s1895_s4 + $0x38] sm:$0xff] %vm141_vm1, %v393_v0 }
 0x2d7   :  { %v371_v2 = vpop.xlane.xlu1 %370 }
 0x2d8   :  { %1368 = vrcp.f32 %v371_v2 }
 0x2d9   :  { %1370 = vrcp.f32 %v1456_v57 }
 0x2de   :  { %v1369_v3 = vpop.eup %1368 }
 0x2df   :  { %v391_v6 = vmul.f32 %v1369_v3, %v1353_v34  ;;  %v1675_v34 = vld [vmem:[#allocation2 + $0x1a0] sm:$0xff]  ;;  %v1371_v58 = vpop.eup %1370 }
 0x2e0   :  { %v542_v59 = vmul.f32 32.0, %v1371_v58  ;;  %vm546_vm3 = vweird.f32 %v1371_v58 }
 0x2e1   :  { %1250 = vmatmul.msk.f32.gmra.mxu3 %vm141_vm1, %v391_v6  ;;  %1207 = vst.msk [vmem:[%s1895_s4 + $0x28] sm:$0xff] %vm141_vm1, %v391_v6 }
 0x2e2   :  { %v543_v61 = vsub.f32 1.0, %v542_v59 }
 0x2e4   :  { %v544_v50 = vmul.f32 %v1371_v58, %v543_v61 }
 0x2e6   :  { %v545_v62 = vadd.f32 %v1371_v58, %v544_v50 }
 0x2e9   :  { %1251 = vmatmul.msk.f32.gmra.mxu3 %vm141_vm1, %v392_v63  ;;  %v1690_v63 = vsel %vm546_vm3, %v1371_v58, %v545_v62 }
 0x2f1   :  { %1252 = vmatmul.msk.f32.gmra.mxu3 %vm141_vm1, %v393_v0 }
 0x335   :  { %v441_v60 = vpop.f32.mrf.mxu3 }
 0x336   :  { %v465_v36 = vmul.f32 %v441_v60, %v1548_v23 }
 0x33d   :  { %v444_v1 = vpop.f32.mrf.mxu3 }
 0x33e   :  { %v466_v13 = vmul.f32 %v444_v1, %v1552_v26 }
 0x345   :  { %v447_v8 = vpop.f32.mrf.mxu3 }
 0x346   :  { %v467_v11 = vmul.f32 %v447_v8, %v1556_v29 }
 0x34d   :  { %v450_v21 = vpop.f32.mrf.mxu3 }
 0x34e   :  { %v468_v10 = vmul.f32 %v450_v21, %v1560_v32  ;;  %v53_v21 = vld [vmem:[#allocation2 + $0x38] sm:$0xff] }
 0x355   :  { %v453_v22 = vpop.f32.mrf.mxu3 }
 0x356   :  { %v469_v33 = vmul.f32 %v453_v22, %v1564_v35  ;;  %v52_v22 = vld [vmem:[#allocation2 + $0x30] sm:$0xff] }
 0x364   :  { %v456_v24 = vpop.f32.mrf.mxu3 }
 0x365   :  { %v470_v31 = vmul.f32 %v456_v24, %v1568_v38  ;;  %v1323_v24 = vpack.i.bf16 %v52_v22, %v53_v21 }
 0x36c   :  { %v459_v9 = vpop.f32.mrf.mxu3 }
 0x36d   :  { %v471_v30 = vmul.f32 %v459_v9, %v1572_v41  ;;  %v51_v9 = vld [vmem:[#allocation2 + $0x28] sm:$0xff] }
 0x374   :  { %v462_v25 = vpop.f32.mrf.mxu3 }
 0x375   :  { %v472_v28 = vmul.f32 %v462_v25, %v1576_v44  ;;  %v50_v25 = vld [vmem:[#allocation2 + $0x20] sm:$0xff] }
 0x377   :  { %488 = vmatpush.msrb.mxu0 %v472_v28  ;;  %v1328_v28 = vpack.i.bf16 %v50_v25, %v51_v9 }
 0x379   :  { %489 = vmatpush.msrb.mxu0 %v471_v30 }
 0x37b   :  { %490 = vmatpush.msrb.mxu0 %v470_v31 }
 0x37d   :  { %491 = vmatpush.msrb.mxu0 %v469_v33 }
 0x37f   :  { %492 = vmatpush.msrb.mxu0 %v468_v10 }
 0x381   :  { %493 = vmatpush.msrb.mxu0 %v467_v11 }
 0x383   :  { %494 = vmatpush.msrb.mxu0 %v466_v13 }
 0x385   :  { %495 = vmatpush.msrb.mxu0 %v465_v36 }
 0x386   :  { %1253 = vmatmul.msk.f32.vlgmr.msrb.gmra.mxu0 %vm473_vm2, %v1675_v34 }
 0x387   :  { %522 = vmatpush.msra.mxu0 %v57_v37 }
 0x389   :  { %523 = vmatpush.msra.mxu0 %v56_v39 }
 0x38b   :  { %524 = vmatpush.msra.mxu0 %v55_v40 }
 0x38d   :  { %525 = vmatpush.msra.mxu0 %v54_v43 }
 0x38e   :  { %1254 = vmatmul.msk.f32.gmra.mxu0 %vm473_vm2, %v1679_v42 }
 0x38f   :  { %611 = vmatpush.msrb.mxu0 %v53_v21 }
 0x391   :  { %612 = vmatpush.msrb.mxu0 %v52_v22 }
 0x393   :  { %613 = vmatpush.msrb.mxu0 %v51_v9 }
 0x395   :  { %614 = vmatpush.msrb.mxu0 %v50_v25 }
 0x403   :  { %v497_v27 = vpop.f32.mrf.mxu0 }
 0x404   :  { %1255 = vmatmul.msk.f32.vlgmr.msra.gmra.mxu0 %vm111_vm0, %v497_v27 }
 0x40b   :  { %v500_v45 = vpop.f32.mrf.mxu0 }
 0x40c   :  { %1256 = vmatmul.msk.f32.gmra.mxu0 %vm111_vm0, %v500_v45 }
 0x481   :  { %v527_v47 = vpop.f32.mrf.mxu0 }
 0x482   :  { %v528_v48 = vadd.f32 %v527_v47, %v503_v46  ;;  %v586_v47 = vperm.slane %v1499_v7, 6 }
 0x484   :  { %v533_v49 = vadd.f32 %v528_v48, %v1488_v4 }
 0x486   :  { %v535_v52 = vsel %vm111_vm0, %v533_v49, 0.0 }
 0x487   :  { %536 = vadd.xlane.f32.xlu0 %v535_v52 }
 0x489   :  { %v530_v51 = vpop.f32.mrf.mxu0 }
 0x48a   :  { %v531_v53 = vadd.f32 %v530_v51, %v503_v46  ;;  %v589_v51 = vperm.slane %v1499_v7, 7 }
 0x48c   :  { %v534_v54 = vadd.f32 %v531_v53, %v1495_v5 }
 0x48e   :  { %v538_v56 = vsel %vm111_vm0, %v534_v54, 0.0 }
 0x48f   :  { %539 = vadd.xlane.f32.xlu2 %v538_v56 }
 0x4fa   :  { %v537_v4 = vpop.xlane.xlu0 %536 }
 0x4fb   :  { %v548_v55 = vmul.f32 %v1690_v63, %v537_v4  ;;  %v592_v4 = vperm.slane %v1499_v7, 1  ;;  %v36_v7 = vld [vmem:[%s1892_s1 + $0x8] sm:$0xff] }
 0x4fd   :  { %v550_v0 = vsub.f32 %v533_v49, %v548_v55  ;;  %639 = vrot.lane.b32.xlu1 %v592_v4, %s1454_s25 }
 0x4ff   :  { %v552_v2 = vmul.f32 %v550_v0, %v550_v0 }
 0x501   :  { %v554_v5 = vsel %vm111_vm0, %v552_v2, 0.0 }
 0x502   :  { %v540_v3 = vpop.xlane.xlu2 %539  ;;  %555 = vadd.xlane.f32.xlu0 %v554_v5 }
 0x503   :  { %v549_v6 = vmul.f32 %v1690_v63, %v540_v3 }
 0x505   :  { %v551_v60 = vsub.f32 %v534_v54, %v549_v6 }
 0x507   :  { %v553_v1 = vmul.f32 %v551_v60, %v551_v60 }
 0x509   :  { %v557_v8 = vsel %vm111_vm0, %v553_v1, 0.0  ;;  %v37_v1 = vld [vmem:[%s1892_s1 + $0x10] sm:$0xf] }
 0x50a   :  { %558 = vadd.xlane.f32.xlu2 %v557_v8 }
 0x516   :  { %1324 = vrot.lane.b32.xlu0 %v1323_v24, %s1454_s25 }
 0x522   :  { %1329 = vrot.lane.b32.xlu2 %v1328_v28, %s1454_s25 }
 0x575   :  { %v556_v30 = vpop.xlane.xlu0 %555 }
 0x576   :  { %v560_v31 = vmul.f32 %v556_v30, %v1690_v63 }
 0x578   :  { %v562_v33 = vadd.f32 1e-05, %v560_v31 }
 0x57a   :  { %1372 = vrsqrt.f32 %v562_v33  ;;  %vm570_vm5 = vweird.f32 %v562_v33 }
 0x57d   :  { %v559_v10 = vpop.xlane.xlu2 %558 }
 0x57e   :  { %v561_v11 = vmul.f32 %v559_v10, %v1690_v63 }
 0x580   :  { %v1373_v13 = vpop.eup %1372  ;;  %v563_v36 = vadd.f32 1e-05, %v561_v11 }
 0x581   :  { %v565_v37 = vmul.f32 %v1373_v13, %v562_v33  ;;  %vm571_vm4 = vweird.f32 %v1373_v13 }
 0x582   :  { %1374 = vrsqrt.f32 %v563_v36  ;;  %vm572_vm6 = vmor %vm570_vm5, %vm571_vm4  ;;  %vm580_vm8 = vweird.f32 %v563_v36 }
 0x583   :  { %v566_v39 = vmul.f32 %v1373_v13, %v565_v37 }
 0x585   :  { %v567_v40 = vmul.f32 0.5, %v566_v39  ;;  %v1330_v5 = vpop.permute.xlu2 %1329 }
 0x586   :  { %v1331_v3 = vunpack.i.l.bf16 %v1330_v5  ;;  %v1332_v6 = vunpack.i.h.bf16 %v1330_v5 }
 0x587   :  { %v568_v43 = vsub.f32 1.5, %v567_v40 }
 0x588   :  { %v1375_v27 = vpop.eup %1374  ;;  %v1325_v55 = vpop.permute.xlu0 %1324 }
 0x589   :  { %v569_v45 = vmul.f32 %v1373_v13, %v568_v43  ;;  %v575_v46 = vmul.f32 %v1375_v27, %v563_v36  ;;  %vm581_vm7 = vweird.f32 %v1375_v27  ;;  %v1327_v2 = vunpack.i.h.bf16 %v1325_v55  ;;  %v100_v43 = vld [vmem:[#allocation2 + $0x1b0] sm:$0xff] }
 0x58a   :  { %vm582_vm9 = vmor %vm580_vm8, %vm581_vm7 }
 0x58b   :  { %v573_v48 = vsel %vm572_vm6, %v1373_v13, %v569_v45  ;;  %v576_v49 = vmul.f32 %v1375_v27, %v575_v46  ;;  %v101_v46 = vld [vmem:[#allocation2 + $0x1b8] sm:$0xff] }
 0x58c   :  { %v584_v52 = vmul.f32 %v573_v48, %v550_v0  ;;  %v1326_v0 = vunpack.i.l.bf16 %v1325_v55 }
 0x58d   :  { %v577_v53 = vmul.f32 0.5, %v576_v49 }
 0x58e   :  { %v587_v54 = vmul.f32 %v586_v47, %v584_v52  ;;  %663 = vmatpush.msrb.mxu1 %v1326_v0  ;;  %v102_v52 = vld [vmem:[#allocation2 + $0x1c0] sm:$0xff] }
 0x58f   :  { %v578_v56 = vsub.f32 1.5, %v577_v53 }
 0x590   :  { %v1702_v57 = vadd.f32 %v589_v51, %v587_v54  ;;  %664 = vmatpush.msrb.mxu1 %v1327_v2 }
 0x591   :  { %v579_v58 = vmul.f32 %v1375_v27, %v578_v56  ;;  %v103_v56 = vld [vmem:[#allocation2 + $0x1c8] sm:$0xff] }
 0x592   :  { %1257 = vmatmul.msk.f32.vlgmr.msrb.gmra.mxu0 %vm111_vm0, %v1702_v57  ;;  %665 = vmatpush.msrb.mxu1 %v1331_v3  ;;  %v105_v3 = vld [vmem:[#allocation2 + $0x1d8] sm:$0xff] }
 0x593   :  { %v583_v59 = vsel %vm582_vm9, %v1375_v27, %v579_v58 }
 0x594   :  { %v585_v61 = vmul.f32 %v583_v59, %v551_v60  ;;  %v35_v60 = vld [vmem:[%s1892_s1] sm:$0xff]  ;;  %666 = vmatpush.msrb.mxu1 %v1332_v6 }
 0x595   :  { %1259 = vmatmul.msk.f32.vlgmr.msrb.gmra.mxu1 %vm111_vm0, %v35_v60 }
 0x596   :  { %v588_v50 = vmul.f32 %v586_v47, %v585_v61 }
 0x598   :  { %v1706_v62 = vadd.f32 %v589_v51, %v588_v50 }
 0x59a   :  { %1258 = vmatmul.msk.f32.gmra.mxu0 %vm111_vm0, %v1706_v62 }
 0x59d   :  { %1260 = vmatmul.msk.f32.gmra.mxu1 %vm111_vm0, %v36_v7 }
 0x5a5   :  { %1261 = vmatmul.msk.f32.gmra.mxu1 %vm111_vm0, %v37_v1 }
 0x60f   :  { %v616_v8 = vpop.f32.mrf.mxu0 }
 0x610   :  { %v617_v24 = vadd.f32 %v616_v8, %v592_v4  ;;  %v106_v8 = vld [vmem:[#allocation2 + $0x1e0] sm:$0xff] }
 0x612   :  { %v668_v9 = vpop.f32.mrf.mxu1 }
 0x617   :  { %v619_v21 = vpop.f32.mrf.mxu0 }
 0x618   :  { %v620_v22 = vadd.f32 %v619_v21, %v592_v4  ;;  %v104_v4 = vld [vmem:[#allocation2 + $0x1d0] sm:$0xff] }
 0x61a   :  { %691 = vmatpush.msrb.mxu3 %v620_v22 }
 0x61c   :  { %692 = vmatpush.msrb.mxu3 %v617_v24 }
 0x61d   :  { %1262 = vmatmul.msk.f32.vlgmr.msrb.gmra.mxu3 %vm141_vm1, %v1509_v12  ;;  %v671_v12 = vpop.f32.mrf.mxu1 }
 0x625   :  { %1263 = vmatmul.msk.f32.gmra.mxu3 %vm141_vm1, %v1518_v14  ;;  %v640_v14 = vpop.permute.xlu1 %639  ;;  %v674_v25 = vpop.f32.mrf.mxu1 }
 0x626   :  { %v1742_v28 = vadd.f32 %v671_v12, %v640_v14  ;;  %v107_v12 = vld [vmem:[#allocation2 + $0x1e8] sm:$0xff] }
 0x62d   :  { %1264 = vmatmul.msk.f32.gmra.mxu3 %vm141_vm1, %v1522_v15  ;;  %v1740_v15 = vadd.f32 %v674_v25, %v640_v14 }
 0x62f   :  { %1270 = vmatpush.xpose.msk.msra.mxu0 %vm111_vm0, %v1740_v15 }
 0x633   :  { %1271 = vmatpush.xpose.msk.msra.mxu0 %vm111_vm0, %v1742_v28 }
 0x635   :  { %1265 = vmatmul.msk.f32.gmra.mxu3 %vm141_vm1, %v1526_v16  ;;  %v1746_v16 = vadd.f32 %v668_v9, %v640_v14 }
 0x637   :  { %1272 = vmatpush.xpose.msk.msra.mxu0 %vm111_vm0, %v1746_v16 }
 0x63d   :  { %1266 = vmatmul.msk.f32.gmra.mxu3 %vm141_vm1, %v1530_v17  ;;  %v1333_v17 = vpack.i.bf16 %v1746_v16, %v1742_v28 }
 0x645   :  { %1267 = vmatmul.msk.f32.gmra.mxu3 %vm141_vm1, %v1534_v18 }
 0x64d   :  { %1268 = vmatmul.msk.f32.gmra.mxu3 %vm141_vm1, %v1538_v19 }
 0x655   :  { %1269 = vmatmul.msk.f32.gmra.mxu3 %vm141_vm1, %v1542_v20 }
 0x6a0   :  { %v694_v18 = vpop.f32.mrf.mxu3 }
 0x6a1   :  { %v718_v19 = vmul.f32 %v694_v18, %v1548_v23 }
 0x6a3   :  { %1273 = vmatmul.msk.f32.vlgmr.msra.gmra.mxu0 %vm111_vm0, %v718_v19 }
 0x6a8   :  { %v697_v20 = vpop.f32.mrf.mxu3 }
 0x6a9   :  { %v719_v30 = vmul.f32 %v697_v20, %v1552_v26 }
 0x6ab   :  { %1274 = vmatmul.msk.f32.gmra.mxu0 %vm111_vm0, %v719_v30 }
 0x6b0   :  { %v700_v31 = vpop.f32.mrf.mxu3 }
 0x6b1   :  { %v720_v33 = vmul.f32 %v700_v31, %v1556_v29 }
 0x6b3   :  { %1275 = vmatmul.msk.f32.gmra.mxu0 %vm111_vm0, %v720_v33 }
 0x6b8   :  { %v703_v10 = vpop.f32.mrf.mxu3 }
 0x6b9   :  { %v721_v11 = vmul.f32 %v703_v10, %v1560_v32 }
 0x6bb   :  { %1276 = vmatmul.msk.f32.gmra.mxu0 %vm111_vm0, %v721_v11 }
 0x6c0   :  { %v706_v13 = vpop.f32.mrf.mxu3 }
 0x6c1   :  { %v722_v23 = vmul.f32 %v706_v13, %v1564_v35 }
 0x6c3   :  { %1277 = vmatmul.msk.f32.gmra.mxu0 %vm111_vm0, %v722_v23 }
 0x6c8   :  { %v709_v36 = vpop.f32.mrf.mxu3 }
 0x6c9   :  { %v723_v26 = vmul.f32 %v709_v36, %v1568_v38 }
 0x6cb   :  { %1278 = vmatmul.msk.f32.gmra.mxu0 %vm111_vm0, %v723_v26 }
 0x6d0   :  { %v712_v37 = vpop.f32.mrf.mxu3 }
 0x6d1   :  { %v724_v29 = vmul.f32 %v712_v37, %v1572_v41 }
 0x6d3   :  { %1279 = vmatmul.msk.f32.gmra.mxu0 %vm111_vm0, %v724_v29 }
 0x6d8   :  { %v715_v39 = vpop.f32.mrf.mxu3 }
 0x6d9   :  { %v725_v32 = vmul.f32 %v715_v39, %v1576_v44 }
 0x6db   :  { %1280 = vmatmul.msk.f32.gmra.mxu0 %vm111_vm0, %v725_v32 }
 0x720   :  { %v776_v40 = vpop.f32.mrf.mxu0 }
 0x721   :  { %v800_v35 = vmul.f32 0.35355338, %v776_v40 }
 0x723   :  { %v808_v27 = vadd.f32 %v800_v35, %v100_v43 }
 0x725   :  { %v817_v45 = vsel %vm816_vm10, %v808_v27, -inf }
 0x726   :  { %818 = vmax.xlane.f32.xlu0 %v817_v45 }
 0x728   :  { %v779_v38 = vpop.f32.mrf.mxu0 }
 0x729   :  { %v801_v47 = vmul.f32 0.35355338, %v779_v38 }
 0x72b   :  { %v809_v48 = vadd.f32 %v801_v47, %v101_v46 }
 0x72d   :  { %v820_v41 = vsel %vm816_vm10, %v809_v48, -inf }
 0x72e   :  { %821 = vmax.xlane.f32.xlu2 %v820_v41 }
 0x730   :  { %v782_v49 = vpop.f32.mrf.mxu0 }
 0x731   :  { %v802_v44 = vmul.f32 0.35355338, %v782_v49 }
 0x733   :  { %v810_v51 = vadd.f32 %v802_v44, %v102_v52 }
 0x735   :  { %v823_v53 = vsel %vm816_vm10, %v810_v51, -inf }
 0x736   :  { %824 = vmax.xlane.f32.xlu1 %v823_v53 }
 0x738   :  { %v785_v54 = vpop.f32.mrf.mxu0 }
 0x739   :  { %v803_v58 = vmul.f32 0.35355338, %v785_v54 }
 0x73b   :  { %v811_v59 = vadd.f32 %v803_v58, %v103_v56 }
 0x73d   :  { %v826_v61 = vsel %vm816_vm10, %v811_v59, -inf }
 0x73e   :  { %827 = vmax.xlane.f32.xlu0 %v826_v61 }
 0x740   :  { %v788_v50 = vpop.f32.mrf.mxu0 }
 0x741   :  { %v804_v55 = vmul.f32 0.35355338, %v788_v50 }
 0x743   :  { %v812_v0 = vadd.f32 %v804_v55, %v104_v4 }
 0x745   :  { %v829_v2 = vsel %vm816_vm10, %v812_v0, -inf }
 0x746   :  { %830 = vmax.xlane.f32.xlu0 %v829_v2 }
 0x748   :  { %v791_v5 = vpop.f32.mrf.mxu0 }
 0x749   :  { %v805_v6 = vmul.f32 0.35355338, %v791_v5 }
 0x74b   :  { %v1775_v60 = vadd.f32 %v805_v6, %v105_v3 }
 0x74d   :  { %v832_v7 = vsel %vm816_vm10, %v1775_v60, -inf }
 0x74e   :  { %833 = vmax.xlane.f32.xlu2 %v832_v7 }
 0x750   :  { %v794_v1 = vpop.f32.mrf.mxu0 }
 0x751   :  { %v806_v21 = vmul.f32 0.35355338, %v794_v1 }
 0x753   :  { %v814_v22 = vadd.f32 %v806_v21, %v106_v8 }
 0x755   :  { %v835_v24 = vsel %vm816_vm10, %v814_v22, -inf }
 0x756   :  { %836 = vmax.xlane.f32.xlu0 %v835_v24 }
 0x758   :  { %v797_v9 = vpop.f32.mrf.mxu0 }
 0x759   :  { %v807_v14 = vmul.f32 0.35355338, %v797_v9 }
 0x75b   :  { %v815_v25 = vadd.f32 %v807_v14, %v107_v12 }
 0x75d   :  { %v838_v18 = vsel %vm816_vm10, %v815_v25, -inf }
 0x75e   :  { %839 = vmax.xlane.f32.xlu1 %v838_v18 }
 0x76a   :  { %909 = vrot.lane.b32.xlu0 %v1740_v15, %s1454_s25 }
 0x799   :  { %v819_v19 = vpop.xlane.xlu0 %818 }
 0x79a   :  { %v841_v20 = vsub.f32 %v808_v27, %v819_v19 }
 0x79c   :  { %v849_v30 = vmul.f32 1.442695, %v841_v20 }
 0x79e   :  { %1376 = vpow2.f32 %v849_v30 }
 0x7a1   :  { %v822_v31 = vpop.xlane.xlu2 %821 }
 0x7a2   :  { %v842_v33 = vsub.f32 %v809_v48, %v822_v31 }
 0x7a4   :  { %v1377_v10 = vpop.eup %1376  ;;  %v851_v11 = vmul.f32 1.442695, %v842_v33 }
 0x7a5   :  { %v865_v13 = vsel %vm816_vm10, %v1377_v10, 0.0 }
 0x7a6   :  { %1378 = vpow2.f32 %v851_v11  ;;  %866 = vadd.xlane.f32.xlu2 %v865_v13 }
 0x7a9   :  { %v825_v23 = vpop.xlane.xlu1 %824 }
 0x7aa   :  { %v843_v36 = vsub.f32 %v810_v51, %v825_v23 }
 0x7ac   :  { %v1379_v26 = vpop.eup %1378  ;;  %v853_v37 = vmul.f32 1.442695, %v843_v36 }
 0x7ad   :  { %v868_v29 = vsel %vm816_vm10, %v1379_v26, 0.0 }
 0x7ae   :  { %1380 = vpow2.f32 %v853_v37  ;;  %869 = vadd.xlane.f32.xlu1 %v868_v29 }
 0x7b1   :  { %v828_v15 = vpop.xlane.xlu0 %827 }
 0x7b2   :  { %v844_v39 = vsub.f32 %v811_v59, %v828_v15 }
 0x7b4   :  { %v1381_v32 = vpop.eup %1380  ;;  %v855_v40 = vmul.f32 1.442695, %v844_v39 }
 0x7b5   :  { %v871_v43 = vsel %vm816_vm10, %v1381_v32, 0.0 }
 0x7b6   :  { %1382 = vpow2.f32 %v855_v40  ;;  %872 = vadd.xlane.f32.xlu1 %v871_v43  ;;  %v1416_v43 = vld [vmem:[#allocation2 + $0x158] sm:$0xff] }
 0x7b9   :  { %v831_v35 = vpop.xlane.xlu0 %830 }
 0x7ba   :  { %v845_v27 = vsub.f32 %v812_v0, %v831_v35 }
 0x7bc   :  { %v1383_v45 = vpop.eup %1382  ;;  %v857_v38 = vmul.f32 1.442695, %v845_v27  ;;  %v1417_v27 = vld [vmem:[#allocation2 + $0x150] sm:$0xff] }
 0x7bd   :  { %v874_v46 = vsel %vm816_vm10, %v1383_v45, 0.0 }
 0x7be   :  { %1384 = vpow2.f32 %v857_v38  ;;  %1334 = vrot.lane.b32.xlu2 %v1333_v17, %s1454_s25  ;;  %875 = vadd.xlane.f32.xlu0 %v874_v46  ;;  %v1418_v38 = vld [vmem:[#allocation2 + $0x148] sm:$0xff] }
 0x7c1   :  { %v834_v51 = vpop.xlane.xlu2 %833 }
 0x7c2   :  { %v846_v58 = vsub.f32 %v1775_v60, %v834_v51  ;;  %v1422_v51 = vld [vmem:[#allocation2 + $0x128] sm:$0xff] }
 0x7c4   :  { %v1385_v47 = vpop.eup %1384  ;;  %v859_v28 = vmul.f32 1.442695, %v846_v58  ;;  %v61_v58 = vld [vmem:[#allocation2 + $0x78] sm:$0xff] }
 0x7c5   :  { %v877_v48 = vsel %vm816_vm10, %v1385_v47, 0.0 }
 0x7c6   :  { %878 = vadd.xlane.f32.xlu1 %v877_v48 }
 0x7c9   :  { %v837_v41 = vpop.xlane.xlu0 %836 }
 0x7ca   :  { %v847_v49 = vsub.f32 %v814_v22, %v837_v41  ;;  %v1420_v41 = vld [vmem:[#allocation2 + $0x138] sm:$0xff] }
 0x7cc   :  { %v861_v52 = vmul.f32 1.442695, %v847_v49 }
 0x7ce   :  { %1386 = vpow2.f32 %v861_v52  ;;  %v1421_v52 = vld [vmem:[#allocation2 + $0x130] sm:$0xff] }
 0x7d1   :  { %v840_v44 = vpop.xlane.xlu1 %839 }
 0x7d2   :  { %v848_v53 = vsub.f32 %v815_v25, %v840_v44 }
 0x7d4   :  { %v1387_v54 = vpop.eup %1386  ;;  %v863_v56 = vmul.f32 1.442695, %v848_v53 }
 0x7d5   :  { %v883_v59 = vsel %vm816_vm10, %v1387_v54, 0.0 }
 0x7d6   :  { %1388 = vpow2.f32 %v863_v56  ;;  %884 = vadd.xlane.f32.xlu1 %v883_v59  ;;  %v60_v59 = vld [vmem:[#allocation2 + $0x70] sm:$0xff] }
 0x7d7   :  { %1390 = vpow2.f32 %v859_v28  ;;  %v59_v28 = vld [vmem:[#allocation2 + $0x68] sm:$0xff] }
 0x7dc   :  { %v1389_v16 = vpop.eup %1388  ;;  %v910_v17 = vpop.permute.xlu0 %909 }
 0x7dd   :  { %1281 = vmatpush.msk.msrb.mxu2 %vm937_vm11, %v910_v17  ;;  %v886_v61 = vsel %vm816_vm10, %v1389_v16, 0.0  ;;  %v1391_v50 = vpop.eup %1390 }
 0x7de   :  { %887 = vadd.xlane.f32.xlu1 %v886_v61  ;;  %v880_v4 = vsel %vm816_vm10, %v1391_v50, 0.0 }
 0x7e7   :  { %881 = vadd.xlane.f32.xlu2 %v880_v4 }
 0x819   :  { %v867_v55 = vpop.xlane.xlu2 %866 }
 0x81a   :  { %1392 = vrcp.f32 %v867_v55 }
 0x820   :  { %v1393_v0 = vpop.eup %1392 }
 0x821   :  { %v1335_v2 = vpop.permute.xlu2 %1334  ;;  %v870_v5 = vpop.xlane.xlu1 %869  ;;  %v897_v3 = vmul.f32 %v1393_v0, %v1377_v10 }
 0x822   :  { %1394 = vrcp.f32 %v870_v5  ;;  %v1336_v6 = vunpack.i.l.bf16 %v1335_v2  ;;  %v1337_v60 = vunpack.i.h.bf16 %v1335_v2 }
 0x823   :  { %1210 = vst.msk [vmem:[%s1895_s4 + $0x40] sm:$0xff] %vm816_vm10, %v897_v3 }
 0x824   :  { %954 = vmatpush.msrb.mxu2 %v1336_v6 }
 0x826   :  { %955 = vmatpush.msrb.mxu2 %v1337_v60 }
 0x827   :  { %1282 = vmatmul.msk.f32.vlgmr.msrb.gmra.mxu2 %vm816_vm10, %v897_v3 }
 0x828   :  { %v1395_v7 = vpop.eup %1394 }
 0x829   :  { %v873_v1 = vpop.xlane.xlu1 %872  ;;  %v898_v8 = vmul.f32 %v1395_v7, %v1379_v26 }
 0x82a   :  { %1396 = vrcp.f32 %v873_v1 }
 0x82b   :  { %1211 = vst.msk [vmem:[%s1895_s4 + $0x48] sm:$0xff] %vm816_vm10, %v898_v8 }
 0x82f   :  { %1283 = vmatmul.msk.f32.gmra.mxu2 %vm816_vm10, %v898_v8 }
 0x830   :  { %v1397_v21 = vpop.eup %1396 }
 0x831   :  { %v876_v22 = vpop.xlane.xlu0 %875  ;;  %v899_v24 = vmul.f32 %v1397_v21, %v1381_v32 }
 0x832   :  { %1398 = vrcp.f32 %v876_v22 }
 0x833   :  { %1212 = vst.msk [vmem:[%s1895_s4 + $0x50] sm:$0xff] %vm816_vm10, %v899_v24 }
 0x837   :  { %1284 = vmatmul.msk.f32.gmra.mxu2 %vm816_vm10, %v899_v24 }
 0x838   :  { %v1399_v9 = vpop.eup %1398 }
 0x839   :  { %v879_v12 = vpop.xlane.xlu1 %878  ;;  %v900_v14 = vmul.f32 %v1399_v9, %v1383_v45 }
 0x83a   :  { %1400 = vrcp.f32 %v879_v12  ;;  %v65_v12 = vld [vmem:[#allocation2 + $0x98] sm:$0xff] }
 0x83b   :  { %1213 = vst.msk [vmem:[%s1895_s4 + $0x58] sm:$0xff] %vm816_vm10, %v900_v14 }
 0x83f   :  { %1285 = vmatmul.msk.f32.gmra.mxu2 %vm816_vm10, %v900_v14  ;;  %v64_v14 = vld [vmem:[#allocation2 + $0x90] sm:$0xff] }
 0x840   :  { %v1401_v25 = vpop.eup %1400 }
 0x841   :  { %v901_v18 = vmul.f32 %v1401_v25, %v1385_v47  ;;  %v1419_v47 = vld [vmem:[#allocation2 + $0x140] sm:$0xff]  ;;  %v63_v25 = vld [vmem:[#allocation2 + $0x88] sm:$0xff] }
 0x843   :  { %1214 = vst.msk [vmem:[%s1895_s4 + $0x60] sm:$0xff] %vm816_vm10, %v901_v18 }
 0x847   :  { %1286 = vmatmul.msk.f32.gmra.mxu2 %vm816_vm10, %v901_v18  ;;  %v62_v18 = vld [vmem:[#allocation2 + $0x80] sm:$0xff] }
 0x849   :  { %v885_v19 = vpop.xlane.xlu1 %884 }
 0x84a   :  { %1402 = vrcp.f32 %v885_v19 }
 0x850   :  { %v1403_v20 = vpop.eup %1402 }
 0x851   :  { %v888_v30 = vpop.xlane.xlu1 %887  ;;  %v903_v31 = vmul.f32 %v1403_v20, %v1387_v54  ;;  %v1423_v54 = vld [vmem:[#allocation2 + $0x120] sm:$0xff] }
 0x852   :  { %1404 = vrcp.f32 %v888_v30 }
 0x853   :  { %1216 = vst.msk [vmem:[%s1895_s4 + $0x70] sm:$0xff] %vm816_vm10, %v903_v31 }
 0x858   :  { %v1405_v33 = vpop.eup %1404 }
 0x859   :  { %v904_v10 = vmul.f32 %v1405_v33, %v1389_v16  ;;  %v58_v16 = vld [vmem:[#allocation2 + $0x60] sm:$0xff]  ;;  %v80_v33 = vld [vmem:[#allocation2 + $0x110] sm:$0xff] }
 0x85a   :  { %v882_v11 = vpop.xlane.xlu2 %881 }
 0x85b   :  { %1406 = vrcp.f32 %v882_v11  ;;  %1217 = vst.msk [vmem:[%s1895_s4 + $0x78] sm:$0xff] %vm816_vm10, %v904_v10 }
 0x861   :  { %v1407_v13 = vpop.eup %1406 }
 0x862   :  { %v902_v23 = vmul.f32 %v1407_v13, %v1391_v50  ;;  %v1842_v50 = vld [vmem:[#allocation2 + $0x1f0] sm:$0xff] }
 0x864   :  { %1287 = vmatmul.msk.f32.gmra.mxu2 %vm816_vm10, %v902_v23  ;;  %1215 = vst.msk [vmem:[%s1895_s4 + $0x68] sm:$0xff] %vm816_vm10, %v902_v23  ;;  %v78_v23 = vld [vmem:[#allocation2 + $0x100] sm:$0xff] }
 0x86c   :  { %1288 = vmatmul.msk.f32.gmra.mxu2 %vm816_vm10, %v903_v31  ;;  %v81_v31 = vld [vmem:[#allocation2 + $0x118] sm:$0xff] }
 0x86d   :  { %1127 = vmatpush.msrb.mxu0 %v81_v31  ;;  %1296 = vmatpush.msra.mxu3 %v81_v31 }
 0x86f   :  { %1128 = vmatpush.msrb.mxu0 %v80_v33  ;;  %1297 = vmatpush.msra.mxu3 %v80_v33 }
 0x874   :  { %1289 = vmatmul.msk.f32.gmra.mxu2 %vm816_vm10, %v904_v10  ;;  %v79_v10 = vld [vmem:[#allocation2 + $0x108] sm:$0xff] }
 0x875   :  { %1129 = vmatpush.msrb.mxu0 %v79_v10  ;;  %1298 = vmatpush.msra.mxu3 %v79_v10 }
 0x877   :  { %1130 = vmatpush.msrb.mxu0 %v78_v23  ;;  %1299 = vmatpush.msra.mxu3 %v78_v23 }
 0x8aa   :  { %v957_v36 = vpop.f32.mrf.mxu2 }
 0x8ab   :  { %v981_v56 = vmul.f32 %v1423_v54, %v957_v36 }
 0x8b2   :  { %v960_v26 = vpop.f32.mrf.mxu2 }
 0x8b3   :  { %v982_v53 = vmul.f32 %v1422_v51, %v960_v26 }
 0x8ba   :  { %v963_v37 = vpop.f32.mrf.mxu2 }
 0x8bb   :  { %v983_v44 = vmul.f32 %v1421_v52, %v963_v37  ;;  %v77_v37 = vld [vmem:[#allocation2 + $0xf8] sm:$0xff] }
 0x8bc   :  { %1131 = vmatpush.msrb.mxu0 %v77_v37  ;;  %1300 = vmatpush.msra.mxu3 %v77_v37 }
 0x8c2   :  { %v966_v29 = vpop.f32.mrf.mxu2 }
 0x8c3   :  { %v984_v49 = vmul.f32 %v1420_v41, %v966_v29  ;;  %v72_v41 = vld [vmem:[#allocation2 + $0xd0] sm:$0xff] }
 0x8ca   :  { %v969_v15 = vpop.f32.mrf.mxu2 }
 0x8cb   :  { %v985_v48 = vmul.f32 %v1419_v47, %v969_v15  ;;  %v76_v15 = vld [vmem:[#allocation2 + $0xf0] sm:$0xff] }
 0x8cc   :  { %1132 = vmatpush.msrb.mxu0 %v76_v15  ;;  %1301 = vmatpush.msra.mxu3 %v76_v15 }
 0x8e7   :  { %v972_v39 = vpop.f32.mrf.mxu2 }
 0x8e8   :  { %v986_v46 = vmul.f32 %v1418_v38, %v972_v39  ;;  %v73_v38 = vld [vmem:[#allocation2 + $0xd8] sm:$0xff] }
 0x8ef   :  { %v975_v32 = vpop.f32.mrf.mxu2 }
 0x8f0   :  { %v987_v45 = vmul.f32 %v1417_v27, %v975_v32  ;;  %v75_v32 = vld [vmem:[#allocation2 + $0xe8] sm:$0xff] }
 0x8f1   :  { %1133 = vmatpush.msrb.mxu0 %v75_v32  ;;  %1302 = vmatpush.msra.mxu3 %v75_v32 }
 0x8f7   :  { %v978_v40 = vpop.f32.mrf.mxu2 }
 0x8f8   :  { %v988_v35 = vmul.f32 %v1416_v43, %v978_v40  ;;  %v74_v43 = vld [vmem:[#allocation2 + $0xe0] sm:$0xff] }
 0x8f9   :  { %1134 = vmatpush.msrb.mxu0 %v74_v43  ;;  %1303 = vmatpush.msra.mxu3 %v74_v43 }
 0x8fa   :  { %997 = vmatpush.msra.mxu1 %v988_v35  ;;  %v1863_v35 = vld [vmem:[#allocation2 + $0x1f8] sm:$0xf] }
 0x8fb   :  { %1135 = vmatpush.msrb.mxu0 %v73_v38  ;;  %1304 = vmatpush.msra.mxu3 %v73_v38  ;;  %v1091_v51 = vperm.slane %v1863_v35, 1  ;;  %v1196_v38 = vperm.slane %v1863_v35, 2 }
 0x8fc   :  { %998 = vmatpush.msra.mxu1 %v987_v45 }
 0x8fd   :  { %1136 = vmatpush.msrb.mxu0 %v72_v41  ;;  %1305 = vmatpush.msra.mxu3 %v72_v41 }
 0x8fe   :  { %999 = vmatpush.msra.mxu1 %v986_v46 }
 0x900   :  { %1000 = vmatpush.msra.mxu1 %v985_v48  ;;  %v1088_v48 = vperm.slane %v1863_v35, 0 }
 0x902   :  { %1001 = vmatpush.msra.mxu1 %v984_v49 }
 0x904   :  { %1002 = vmatpush.msra.mxu1 %v983_v44 }
 0x906   :  { %1003 = vmatpush.msra.mxu1 %v982_v53  ;;  %v71_v53 = vld [vmem:[#allocation2 + $0xc8] sm:$0xff] }
 0x907   :  { %1137 = vmatpush.msrb.mxu0 %v71_v53  ;;  %1306 = vmatpush.msra.mxu3 %v71_v53 }
 0x908   :  { %1004 = vmatpush.msra.mxu1 %v981_v56 }
 0x909   :  { %1290 = vmatmul.msk.f32.vlgmr.msra.gmra.mxu1 %vm473_vm2, %v1675_v34  ;;  %v1012_v34 = vperm.slane %v1842_v50, 3 }
 0x90a   :  { %1031 = vmatpush.msrb.mxu1 %v61_v58  ;;  %v70_v58 = vld [vmem:[#allocation2 + $0xc0] sm:$0xff] }
 0x90b   :  { %1138 = vmatpush.msrb.mxu0 %v70_v58  ;;  %1307 = vmatpush.msra.mxu3 %v70_v58 }
 0x90c   :  { %1032 = vmatpush.msrb.mxu1 %v60_v59 }
 0x90e   :  { %1033 = vmatpush.msrb.mxu1 %v59_v28 }
 0x910   :  { %1034 = vmatpush.msrb.mxu1 %v58_v16  ;;  %v69_v16 = vld [vmem:[#allocation2 + $0xb8] sm:$0xff] }
 0x911   :  { %1291 = vmatmul.msk.f32.gmra.mxu1 %vm473_vm2, %v1679_v42  ;;  %1139 = vmatpush.msrb.mxu0 %v69_v16 }
 0x912   :  { %1113 = vmatpush.msra.mxu1 %v65_v12  ;;  %1308 = vmatpush.msra.mxu3 %v69_v16 }
 0x914   :  { %1114 = vmatpush.msra.mxu1 %v64_v14 }
 0x916   :  { %1115 = vmatpush.msra.mxu1 %v63_v25 }
 0x918   :  { %1116 = vmatpush.msra.mxu1 %v62_v18 }
 0x986   :  { %v1006_v17 = vpop.f32.mrf.mxu1 }
 0x987   :  { %1292 = vmatmul.msk.f32.vlgmr.msrb.gmra.mxu1 %vm111_vm0, %v1006_v17 }
 0x98e   :  { %v1009_v61 = vpop.f32.mrf.mxu1 }
 0x98f   :  { %1293 = vmatmul.msk.f32.gmra.mxu1 %vm111_vm0, %v1009_v61 }
 0xa04   :  { %v1036_v4 = vpop.f32.mrf.mxu1 }
 0xa05   :  { %v1037_v55 = vadd.f32 %v1036_v4, %v1012_v34 }
 0xa07   :  { %v1042_v0 = vadd.f32 %v1037_v55, %v1702_v57 }
 0xa09   :  { %v1044_v2 = vsel %vm111_vm0, %v1042_v0, 0.0 }
 0xa0a   :  { %1045 = vadd.xlane.f32.xlu1 %v1044_v2  ;;  %v67_v2 = vld [vmem:[#allocation2 + $0xa8] sm:$0xff] }
 0xa0c   :  { %v1039_v42 = vpop.f32.mrf.mxu1 }
 0xa0d   :  { %v1040_v5 = vadd.f32 %v1039_v42, %v1012_v34  ;;  %v66_v42 = vld [vmem:[#allocation2 + $0xa0] sm:$0xff] }
 0xa0f   :  { %v1043_v3 = vadd.f32 %v1040_v5, %v1706_v62  ;;  %v1094_v5 = vperm.slane %v1842_v50, 4 }
 0xa11   :  { %v1047_v6 = vsel %vm111_vm0, %v1043_v3, 0.0 }
 0xa12   :  { %1048 = vadd.xlane.f32.xlu1 %v1047_v6 }
 0xa7d   :  { %v1046_v60 = vpop.xlane.xlu1 %1045 }
 0xa7e   :  { %v1050_v7 = vmul.f32 %v1046_v60, %v1690_v63 }
 0xa80   :  { %v1850_v1 = vsub.f32 %v1042_v0, %v1050_v7  ;;  %v68_v0 = vld [vmem:[#allocation2 + $0xb0] sm:$0xff] }
 0xa81   :  { %1140 = vmatpush.msrb.mxu0 %v68_v0  ;;  %1309 = vmatpush.msra.mxu3 %v68_v0 }
 0xa82   :  { %v1054_v8 = vmul.f32 %v1850_v1, %v1850_v1 }
 0xa83   :  { %1141 = vmatpush.msrb.mxu0 %v67_v2  ;;  %1310 = vmatpush.msra.mxu3 %v67_v2 }
 0xa84   :  { %v1056_v57 = vsel %vm111_vm0, %v1054_v8, 0.0 }
 0xa85   :  { %1057 = vadd.xlane.f32.xlu0 %v1056_v57  ;;  %v1049_v21 = vpop.xlane.xlu1 %1048  ;;  %1142 = vmatpush.msrb.mxu0 %v66_v42  ;;  %v1126_v57 = vperm.slane %v1842_v50, 5 }
 0xa86   :  { %v1051_v22 = vmul.f32 %v1049_v21, %v1690_v63  ;;  %1311 = vmatpush.msra.mxu3 %v66_v42 }
 0xa88   :  { %v1856_v24 = vsub.f32 %v1043_v3, %v1051_v22 }
 0xa8a   :  { %v1055_v62 = vmul.f32 %v1856_v24, %v1856_v24 }
 0xa8c   :  { %v1059_v9 = vsel %vm111_vm0, %v1055_v62, 0.0 }
 0xa8d   :  { %1060 = vadd.xlane.f32.xlu1 %v1059_v9 }
 0xaf8   :  { %v1058_v19 = vpop.xlane.xlu0 %1057 }
 0xaf9   :  { %v1062_v20 = vmul.f32 %v1058_v19, %v1690_v63 }
 0xafb   :  { %v1064_v30 = vadd.f32 1e-05, %v1062_v20 }
 0xafd   :  { %1408 = vrsqrt.f32 %v1064_v30  ;;  %vm1072_vm13 = vweird.f32 %v1064_v30 }
 0xb00   :  { %v1061_v11 = vpop.xlane.xlu1 %1060 }
 0xb01   :  { %v1063_v13 = vmul.f32 %v1061_v11, %v1690_v63 }
 0xb03   :  { %v1409_v36 = vpop.eup %1408  ;;  %v1065_v26 = vadd.f32 1e-05, %v1063_v13 }
 0xb04   :  { %v1067_v29 = vmul.f32 %v1409_v36, %v1064_v30  ;;  %vm1073_vm12 = vweird.f32 %v1409_v36 }
 0xb05   :  { %1410 = vrsqrt.f32 %v1065_v26  ;;  %vm1074_vm14 = vmor %vm1072_vm13, %vm1073_vm12  ;;  %vm1082_vm1 = vweird.f32 %v1065_v26 }
 0xb06   :  { %v1068_v39 = vmul.f32 %v1409_v36, %v1067_v29 }
 0xb08   :  { %v1069_v40 = vmul.f32 0.5, %v1068_v39 }
 0xb0a   :  { %v1070_v27 = vsub.f32 1.5, %v1069_v40 }
 0xb0b   :  { %v1411_v45 = vpop.eup %1410 }
 0xb0c   :  { %v1071_v46 = vmul.f32 %v1409_v36, %v1070_v27  ;;  %v1077_v47 = vmul.f32 %v1411_v45, %v1065_v26  ;;  %vm1083_vm15 = vweird.f32 %v1411_v45 }
 0xb0d   :  { %vm1084_vm2 = vmor %vm1082_vm1, %vm1083_vm15 }
 0xb0e   :  { %v1075_v49 = vsel %vm1074_vm14, %v1409_v36, %v1071_v46  ;;  %v1078_v52 = vmul.f32 %v1411_v45, %v1077_v47  ;;  %v1199_v47 = vperm.slane %v1863_v35, 3 }
 0xb0f   :  { %v1086_v44 = vmul.f32 %v1075_v49, %v1850_v1 }
 0xb10   :  { %v1079_v54 = vmul.f32 0.5, %v1078_v52 }
 0xb11   :  { %v1089_v56 = vmul.f32 %v1088_v48, %v1086_v44 }
 0xb12   :  { %v1080_v59 = vsub.f32 1.5, %v1079_v54 }
 0xb13   :  { %v1092_v28 = vadd.f32 %v1091_v51, %v1089_v56 }
 0xb14   :  { %v1081_v17 = vmul.f32 %v1411_v45, %v1080_v59 }
 0xb15   :  { %1294 = vmatmul.msk.f32.vlgmr.msra.gmra.mxu1 %vm111_vm0, %v1092_v28 }
 0xb16   :  { %v1085_v61 = vsel %vm1084_vm2, %v1411_v45, %v1081_v17 }
 0xb17   :  { %v1087_v34 = vmul.f32 %v1085_v61, %v1856_v24 }
 0xb19   :  { %v1090_v4 = vmul.f32 %v1088_v48, %v1087_v34 }
 0xb1b   :  { %v1093_v55 = vadd.f32 %v1091_v51, %v1090_v4 }
 0xb1d   :  { %1295 = vmatmul.msk.f32.gmra.mxu1 %vm111_vm0, %v1093_v55 }
 0xb92   :  { %v1118_v3 = vpop.f32.mrf.mxu1 }
 0xb93   :  { %v1119_v6 = vadd.f32 %v1118_v3, %v1094_v5 }
 0xb95   :  { %v1124_v60 = vmax.f32 %v1119_v6, 0.0 }
 0xb97   :  { %1143 = vmatmul.f32.vlgmr.msrb.gmra.mxu0 %v1124_v60 }
 0xb9a   :  { %v1121_v7 = vpop.f32.mrf.mxu1 }
 0xb9b   :  { %v1122_v1 = vadd.f32 %v1121_v7, %v1094_v5 }
 0xb9d   :  { %v1125_v8 = vmax.f32 %v1122_v1, 0.0 }
 0xb9f   :  { %1146 = vmatmul.f32.vlgmr.msra.gmra.mxu3 %v1125_v8 }
 0xc14   :  { %v1144_v21 = vpop.f32.mrf.mxu0 }
 0xc15   :  { %v1145_v22 = vadd.f32 %v1144_v21, %v1126_v57 }
 0xc17   :  { %v1150_v24 = vadd.f32 %v1145_v22, %v1092_v28 }
 0xc19   :  { %v1152_v62 = vsel %vm111_vm0, %v1150_v24, 0.0 }
 0xc1a   :  { %1153 = vadd.xlane.f32.xlu2 %v1152_v62 }
 0xc22   :  { %v1147_v9 = vpop.f32.mrf.mxu3 }
 0xc23   :  { %v1148_v12 = vadd.f32 %v1147_v9, %v1126_v57 }
 0xc25   :  { %v1151_v14 = vadd.f32 %v1148_v12, %v1093_v55 }
 0xc27   :  { %v1155_v25 = vsel %vm111_vm0, %v1151_v14, 0.0 }
 0xc28   :  { %1156 = vadd.xlane.f32.xlu0 %v1155_v25 }
 0xc8d   :  { %v1154_v18 = vpop.xlane.xlu2 %1153 }
 0xc8e   :  { %v1158_v19 = vmul.f32 %v1154_v18, %v1690_v63 }
 0xc90   :  { %v1160_v20 = vsub.f32 %v1150_v24, %v1158_v19 }
 0xc92   :  { %v1162_v30 = vmul.f32 %v1160_v20, %v1160_v20 }
 0xc94   :  { %v1164_v31 = vsel %vm111_vm0, %v1162_v30, 0.0 }
 0xc95   :  { %1165 = vadd.xlane.f32.xlu1 %v1164_v31 }
 0xc9b   :  { %v1157_v50 = vpop.xlane.xlu0 %1156 }
 0xc9c   :  { %v1159_v33 = vmul.f32 %v1157_v50, %v1690_v63 }
 0xc9e   :  { %v1161_v10 = vsub.f32 %v1151_v14, %v1159_v33 }
 0xca0   :  { %v1163_v11 = vmul.f32 %v1161_v10, %v1161_v10 }
 0xca2   :  { %v1167_v13 = vsel %vm111_vm0, %v1163_v11, 0.0 }
 0xca3   :  { %1168 = vadd.xlane.f32.xlu2 %v1167_v13 }
 0xd08   :  { %v1166_v23 = vpop.xlane.xlu1 %1165 }
 0xd09   :  { %v1170_v36 = vmul.f32 %v1166_v23, %v1690_v63 }
 0xd0b   :  { %v1172_v26 = vadd.f32 1e-05, %v1170_v36 }
 0xd0d   :  { %1412 = vrsqrt.f32 %v1172_v26  ;;  %vm1180_vm4 = vweird.f32 %v1172_v26 }
 0xd13   :  { %v1413_v37 = vpop.eup %1412 }
 0xd14   :  { %v1175_v29 = vmul.f32 %v1413_v37, %v1172_v26  ;;  %vm1181_vm3 = vweird.f32 %v1413_v37 }
 0xd15   :  { %vm1182_vm5 = vmor %vm1180_vm4, %vm1181_vm3 }
 0xd16   :  { %v1176_v15 = vmul.f32 %v1413_v37, %v1175_v29  ;;  %v1169_v39 = vpop.xlane.xlu2 %1168 }
 0xd17   :  { %v1171_v32 = vmul.f32 %v1169_v39, %v1690_v63 }
 0xd18   :  { %v1177_v40 = vmul.f32 0.5, %v1176_v15 }
 0xd19   :  { %v1173_v43 = vadd.f32 1e-05, %v1171_v32 }
 0xd1a   :  { %v1178_v27 = vsub.f32 1.5, %v1177_v40 }
 0xd1b   :  { %1414 = vrsqrt.f32 %v1173_v43  ;;  %vm1190_vm7 = vweird.f32 %v1173_v43 }
 0xd1c   :  { %v1179_v45 = vmul.f32 %v1413_v37, %v1178_v27 }
 0xd1e   :  { %v1183_v46 = vsel %vm1182_vm5, %v1413_v37, %v1179_v45 }
 0xd1f   :  { %v1194_v48 = vmul.f32 %v1183_v46, %v1160_v20 }
 0xd21   :  { %v1415_v41 = vpop.eup %1414  ;;  %v1197_v49 = vmul.f32 %v1196_v38, %v1194_v48 }
 0xd22   :  { %v1185_v52 = vmul.f32 %v1415_v41, %v1173_v43  ;;  %vm1191_vm6 = vweird.f32 %v1415_v41 }
 0xd23   :  { %v1200_v44 = vadd.f32 %v1199_v47, %v1197_v49  ;;  %vm1192_vm8 = vmor %vm1190_vm7, %vm1191_vm6 }
 0xd24   :  { %v1186_v51 = vmul.f32 %v1415_v41, %v1185_v52 }
 0xd25   :  { %1218 = vst.msk [vmem:[%s1895_s4 + $0x80] sm:$0xff] %vm111_vm0, %v1200_v44 }
 0xd26   :  { %v1187_v63 = vmul.f32 0.5, %v1186_v51 }
 0xd28   :  { %v1188_v53 = vsub.f32 1.5, %v1187_v63 }
 0xd2a   :  { %v1189_v54 = vmul.f32 %v1415_v41, %v1188_v53 }
 0xd2c   :  { %v1193_v56 = vsel %vm1192_vm8, %v1415_v41, %v1189_v54 }
 0xd2d   :  { %v1195_v58 = vmul.f32 %v1193_v56, %v1161_v10 }
 0xd2f   :  { %v1198_v35 = vmul.f32 %v1196_v38, %v1195_v58 }
 0xd31   :  { %v1201_v59 = vadd.f32 %v1199_v47, %v1198_v35 }
 0xd33   :  { %1219 = vst.msk [vmem:[%s1895_s4 + $0x88] sm:$0xff] %vm111_vm0, %v1201_v59 }
 0xd34   :  { %1224 = vsyncpa [#allocation3], 1 }

</bundles_post_ra>
